<compile_context>
chip_gen: v7x
topology: tpu7x:2x2x1
jax: 0.10.0
libtpu: 0.0.40
codegen_flags: <defaults>
</compile_context>

<pallas_src>
import jax
import jax.numpy as jnp
from jax.experimental import pallas as pl
from jax.experimental.pallas import tpu as pltpu


def fm_kernel(x_ref, w_ref, b_ref, vt_ref, v2t_ref, sig_ref, lin_ref, part_ref):
    x = x_ref[...]                                        # (TB, n) f32

    # Primary module output: sigmoid via a single tanh (one EUP push per vreg).
    sig_ref[...] = (0.5 * jnp.tanh(0.5 * x) + 0.5).astype(sig_ref.dtype)

    # Per-row linear term, stored lane-dense as (1, TB):
    # contract the feature dim of w (1,n) with the feature dim of x (TB,n).
    lin = jnp.einsum("on,bn->ob", w_ref[...], x,
                     preferred_element_type=jnp.float32)  # (1, TB)
    lin_ref[...] = lin + b_ref[0, 0]

    # Interaction partial sums for this tile (no global scalar reduction here).
    inter1 = jnp.dot(x, vt_ref[...],
                     preferred_element_type=jnp.float32)            # (TB, KP)
    inter2 = jnp.dot(x * x, v2t_ref[...],
                     preferred_element_type=jnp.float32)            # (TB, KP)
    diff = inter1 * inter1 - inter2                                  # (TB, KP)
    tb, kp = diff.shape
    # Reduce only across vregs (leading axis) -> (8, KP): pure VPU adds.
    part_ref[0] = jnp.sum(diff.reshape(tb // 8, 8, kp), axis=0)


def _plan_tiles(n, kp):
    """Pick the batch tile TB and the scoped-VMEM limit from hardware capacity."""
    try:
        phys = int(pltpu.get_tpu_info().vmem_capacity_bytes)
    except Exception:
        phys = 64 * 1024 * 1024  # conservative fallback (v7x per-TC VMEM)
    # ~75% of physical, never above 100 MiB (96 MiB on v5e/v6e, ~48 MiB on v7x).
    vmem_limit = min(phys * 3 // 4, 100 * 1024 * 1024)

    # Resident, double-buffered blocks: vt, v2t, w, plus the small partial output.
    resident = 2 * (2 * n * kp * 4) + 2 * 8 * n * 4 + 2 * 8 * kp * 4
    headroom = 2 * 1024 * 1024
    budget = max(vmem_limit - resident - headroom, 4 * 1024 * 1024)

    # Per batch-row cost: x tile (2 bufs) + sigmoid tile (2 bufs) + lane-dense lin.
    per_row = 16 * n + 8
    tb = budget // per_row
    tb = max(128, min(int(tb), 8192))
    tb = (tb // 128) * 128
    return tb, int(vmem_limit)


def fm_forward(x, w, b, v, *, max_tb=None):
    """x: (B, n); w: (1, n); b: (1, 1); v: (k, n).  Returns (sigmoid(x), fm_score)."""
    B, n = x.shape
    k = v.shape[0]
    kp = 128 * max(1, pl.cdiv(k, 128))                    # factor dim padded to lanes

    tb, vmem_limit = _plan_tiles(n, kp)
    if max_tb is not None:
        tb = min(tb, int(max_tb))
    tb = max(128, (tb // 128) * 128)
    tb = min(tb, 128 * pl.cdiv(B, 128))                   # don't exceed (rounded) batch

    b_pad = tb * pl.cdiv(B, tb)
    xp = x.astype(jnp.float32)
    if b_pad != B:
        xp = jnp.pad(xp, ((0, b_pad - B), (0, 0)))        # zero rows: no effect on partials
    G = b_pad // tb

    # Layout plumbing once in the wrapper (no in-kernel transposes):
    vt = jnp.zeros((n, kp), jnp.float32).at[:, :k].set(
        jnp.transpose(v).astype(jnp.float32))             # (n, KP)  padded v.T
    v2t = vt * vt                                         # (n, KP)  padded (v^2).T
    wf = jnp.reshape(w, (1, n)).astype(jnp.float32)
    b2 = jnp.reshape(b, (1, 1)).astype(jnp.float32)       # SMEM scalar

    sig, lin, part = pl.pallas_call(
        fm_kernel,
        out_shape=(
            jax.ShapeDtypeStruct((b_pad, n), jnp.float32),   # sigmoid(x)  (primary)
            jax.ShapeDtypeStruct((1, b_pad), jnp.float32),   # linear part, lane-dense
            jax.ShapeDtypeStruct((G, 8, kp), jnp.float32),   # per-tile interaction partials
        ),
        grid_spec=pltpu.PrefetchScalarGridSpec(
            num_scalar_prefetch=0,
            grid=(G,),
            in_specs=[
                pl.BlockSpec((tb, n), lambda i: (i, 0)),                  # x tile
                pl.BlockSpec((1, n), lambda i: (0, 0)),                   # w (resident)
                pl.BlockSpec(memory_space=pltpu.MemorySpace.SMEM),        # b scalar
                pl.BlockSpec((n, kp), lambda i: (0, 0)),                  # v.T padded
                pl.BlockSpec((n, kp), lambda i: (0, 0)),                  # (v^2).T padded
            ],
            out_specs=[
                pl.BlockSpec((tb, n), lambda i: (i, 0)),                  # sigmoid tile
                pl.BlockSpec((1, tb), lambda i: (0, i)),                  # linear (lane-dense)
                pl.BlockSpec((1, 8, kp), lambda i: (i, 0, 0)),            # partials
            ],
        ),
        # No cross-iteration accumulator -> batch-tile axis is fully parallel
        # (shardable across v7x's two TensorCores).
        compiler_params=pltpu.CompilerParams(
            dimension_semantics=("parallel",),
            vmem_limit_bytes=vmem_limit,
        ),
    )(xp, wf, b2, vt, v2t)

    # Final reductions / layout fixes in the wrapper (cheap XLA ops).
    scal = jnp.sum(part)                                  # global interaction scalar
    lin_col = jnp.reshape(lin[0, :B], (B, 1))
    fm_score = lin_col + 0.5 * scal                       # computed-but-unused in torch

    sig = sig[:B].astype(x.dtype)
    # torch: return torch.sigmoid(x.squeeze(1)); squeeze(1) only acts when n == 1.
    out = jnp.squeeze(sig, axis=1) if n == 1 else sig
    return out, fm_score


if __name__ == "__main__":
    # Deterministic small setup; B chosen non-divisible by the tile to exercise the
    # padded-tail path and a multi-step grid (max_tb=512 -> 3 grid steps).
    B, n, k = 1200, 128, 8
    key = jax.random.PRNGKey(0)
    kx, kw, kb, kv = jax.random.split(key, 4)

    x = jax.random.normal(kx, (B, n), dtype=jnp.float32) * 0.5
    w = jax.random.normal(kw, (1, n), dtype=jnp.float32) * 0.1    # nn.Linear weight
    b = jax.random.normal(kb, (1, 1), dtype=jnp.float32) * 0.1    # nn.Linear bias
    v = jax.random.normal(kv, (k, n), dtype=jnp.float32) * 0.25   # factor matrix

    out, fm_score = fm_forward(x, w, b, v, max_tb=512)
    out = jax.block_until_ready(out)
    fm_score = jax.block_until_ready(fm_score)

    # Reference check in plain JAX (mirrors the PyTorch forward exactly).
    ref_out = jax.nn.sigmoid(x)
    ref_fm = (x @ w.T + b
              + 0.5 * (jnp.sum((x @ v.T) ** 2) - jnp.sum((x ** 2) @ (v ** 2).T)))
    assert out.shape == ref_out.shape, "sigmoid output shape mismatch"
    assert jnp.allclose(out, ref_out, atol=1e-5), "sigmoid output mismatch"
    assert fm_score.shape == ref_fm.shape, "FM score shape mismatch"
    assert jnp.allclose(fm_score, ref_fm, rtol=2e-3, atol=0.5), "FM score mismatch"

    print("KERNEL_OK")
</pallas_src>

<mosaic_0001>
module attributes {stable_mosaic.version = 11 : i64} {
  func.func @fm_kernel(%arg0: i32, %arg1: memref<512x128xf32, #tpu.memory_space<vmem>>, %arg2: memref<1x128xf32, #tpu.memory_space<vmem>>, %arg3: memref<1x1xf32, #tpu.memory_space<smem>>, %arg4: memref<128x128xf32, #tpu.memory_space<vmem>>, %arg5: memref<128x128xf32, #tpu.memory_space<vmem>>, %arg6: memref<512x128xf32, #tpu.memory_space<vmem>>, %arg7: memref<1x512xf32, #tpu.memory_space<vmem>>, %arg8: memref<1x8x128xf32, #tpu.memory_space<vmem>>) attributes {dimension_semantics = [#tpu.dimension_semantics<parallel>], iteration_bounds = array<i64: 3>, scalar_prefetch = 0 : i64, scratch_operands = 0 : i64, tpu.core_type = #tpu.core_type<tc>, window_params = [{transform_indices = @transform_0, window_bounds = array<i64: 512, 128>}, {pipeline_mode = #tpu.pipeline_mode<synchronous>, transform_indices = @transform_1, window_bounds = array<i64: 1, 128>}, {transform_indices = @transform_2, window_bounds = array<i64: 1, 1>}, {pipeline_mode = #tpu.pipeline_mode<synchronous>, transform_indices = @transform_3, window_bounds = array<i64: 128, 128>}, {pipeline_mode = #tpu.pipeline_mode<synchronous>, transform_indices = @transform_4, window_bounds = array<i64: 128, 128>}, {transform_indices = @transform_5, window_bounds = array<i64: 512, 128>}, {transform_indices = @transform_6, window_bounds = array<i64: 1, 512>}, {transform_indices = @transform_7, window_bounds = array<i64: 1, 8, 128>}]} {
    %c0 = arith.constant 0 : index
    %c0_0 = arith.constant 0 : index
    %0 = vector.load %arg1[%c0, %c0_0] : memref<512x128xf32, #tpu.memory_space<vmem>>, vector<512x128xf32>
    %cst = arith.constant 5.000000e-01 : f32
    %1 = vector.broadcast %cst : f32 to vector<512x128xf32>
    %2 = arith.mulf %1, %0 : vector<512x128xf32>
    %3 = math.tanh %2 : vector<512x128xf32>
    %cst_1 = arith.constant 5.000000e-01 : f32
    %4 = vector.broadcast %cst_1 : f32 to vector<512x128xf32>
    %5 = arith.mulf %4, %3 : vector<512x128xf32>
    %cst_2 = arith.constant 5.000000e-01 : f32
    %6 = vector.broadcast %cst_2 : f32 to vector<512x128xf32>
    %7 = arith.addf %5, %6 : vector<512x128xf32>
    %c0_3 = arith.constant 0 : index
    %c0_4 = arith.constant 0 : index
    %8 = vector.load %arg6[%c0_3, %c0_4] : memref<512x128xf32, #tpu.memory_space<vmem>>, vector<512x128xf32>
    tpu.vector_store %arg6[%c0_3, %c0_4], %7 {strides = array<i32>} : memref<512x128xf32, #tpu.memory_space<vmem>>, vector<512x128xf32>,
    %c0_5 = arith.constant 0 : index
    %c0_6 = arith.constant 0 : index
    %9 = vector.load %arg2[%c0_5, %c0_6] : memref<1x128xf32, #tpu.memory_space<vmem>>, vector<1x128xf32>
    "tpu.trace_start"() <{level = 10 : i32, message = "on,bn->ob"}> : () -> ()
    %cst_7 = arith.constant dense<0.000000e+00> : vector<1x512xf32>
    %10 = tpu.matmul %9, %0, %cst_7 {dimension_numbers = #tpu.dot_dimension_numbers<[1], [1], [0], [0], [0, 0, 1, 0], [], []>} : vector<1x128xf32>, vector<512x128xf32>, vector<1x512xf32> -> vector<1x512xf32>
    "tpu.trace_stop"() : () -> ()
    %c0_8 = arith.constant 0 : index
    %c0_9 = arith.constant 0 : index
    %11 = memref.load %arg3[%c0_8, %c0_9] : memref<1x1xf32, #tpu.memory_space<smem>>
    %12 = vector.broadcast %11 : f32 to vector<1x512xf32>
    %13 = arith.addf %10, %12 : vector<1x512xf32>
    %c0_10 = arith.constant 0 : index
    %c0_11 = arith.constant 0 : index
    %14 = vector.load %arg7[%c0_10, %c0_11] : memref<1x512xf32, #tpu.memory_space<vmem>>, vector<1x512xf32>
    tpu.vector_store %arg7[%c0_10, %c0_11], %13 {strides = array<i32>} : memref<1x512xf32, #tpu.memory_space<vmem>>, vector<1x512xf32>,
    %c0_12 = arith.constant 0 : index
    %c0_13 = arith.constant 0 : index
    %15 = vector.load %arg4[%c0_12, %c0_13] : memref<128x128xf32, #tpu.memory_space<vmem>>, vector<128x128xf32>
    %cst_14 = arith.constant dense<0.000000e+00> : vector<512x128xf32>
    %16 = tpu.matmul %0, %15, %cst_14 {dimension_numbers = #tpu.dot_dimension_numbers<[1], [0], [0], [1], [0, 0, 1, 1], [], []>} : vector<512x128xf32>, vector<128x128xf32>, vector<512x128xf32> -> vector<512x128xf32>
    %17 = arith.mulf %0, %0 : vector<512x128xf32>
    %c0_15 = arith.constant 0 : index
    %c0_16 = arith.constant 0 : index
    %18 = vector.load %arg5[%c0_15, %c0_16] : memref<128x128xf32, #tpu.memory_space<vmem>>, vector<128x128xf32>
    %cst_17 = arith.constant dense<0.000000e+00> : vector<512x128xf32>
    %19 = tpu.matmul %17, %18, %cst_17 {dimension_numbers = #tpu.dot_dimension_numbers<[1], [0], [0], [1], [0, 0, 1, 1], [], []>} : vector<512x128xf32>, vector<128x128xf32>, vector<512x128xf32> -> vector<512x128xf32>
    %20 = arith.mulf %16, %16 : vector<512x128xf32>
    %21 = arith.subf %20, %19 : vector<512x128xf32>
    %22 = vector.shape_cast %21 : vector<512x128xf32> to vector<64x8x128xf32>
    %cst_18 = arith.constant dense<0.000000e+00> : vector<8x128xf32>
    %23 = vector.multi_reduction <add>, %22, %cst_18 [0] : vector<64x8x128xf32> to vector<8x128xf32>
    %c0_19 = arith.constant 0 : index
    %c0_20 = arith.constant 0 : index
    %c0_21 = arith.constant 0 : index
    %24 = vector.load %arg8[%c0_19, %c0_20, %c0_21] : memref<1x8x128xf32, #tpu.memory_space<vmem>>, vector<1x8x128xf32>
    %25 = vector.shape_cast %24 : vector<1x8x128xf32> to vector<8x128xf32>
    %26 = vector.shape_cast %23 : vector<8x128xf32> to vector<1x8x128xf32>
    tpu.vector_store %arg8[%c0_19, %c0_20, %c0_21], %26 {strides = array<i32>} : memref<1x8x128xf32, #tpu.memory_space<vmem>>, vector<1x8x128xf32>,
    return
  }
  func.func @transform_0(%arg0: i32) -> (i32, i32) {
    %c0_i32 = arith.constant 0 : i32
    %c0_i32_0 = arith.constant 0 : i32
    return %arg0, %c0_i32 : i32, i32
  }
  func.func @transform_1(%arg0: i32) -> (i32, i32) {
    %c0_i32 = arith.constant 0 : i32
    %c0_i32_0 = arith.constant 0 : i32
    %c0_i32_1 = arith.constant 0 : i32
    return %c0_i32, %c0_i32_0 : i32, i32
  }
  func.func @transform_2(%arg0: i32) -> (i32, i32) {
    %c0_i32 = arith.constant 0 : i32
    %c0_i32_0 = arith.constant 0 : i32
    %c0_i32_1 = arith.constant 0 : i32
    return %c0_i32, %c0_i32_0 : i32, i32
  }
  func.func @transform_3(%arg0: i32) -> (i32, i32) {
    %c0_i32 = arith.constant 0 : i32
    %c0_i32_0 = arith.constant 0 : i32
    %c0_i32_1 = arith.constant 0 : i32
    return %c0_i32, %c0_i32_0 : i32, i32
  }
  func.func @transform_4(%arg0: i32) -> (i32, i32) {
    %c0_i32 = arith.constant 0 : i32
    %c0_i32_0 = arith.constant 0 : i32
    %c0_i32_1 = arith.constant 0 : i32
    return %c0_i32, %c0_i32_0 : i32, i32
  }
  func.func @transform_5(%arg0: i32) -> (i32, i32) {
    %c0_i32 = arith.constant 0 : i32
    %c0_i32_0 = arith.constant 0 : i32
    return %arg0, %c0_i32 : i32, i32
  }
  func.func @transform_6(%arg0: i32) -> (i32, i32) {
    %c0_i32 = arith.constant 0 : i32
    %c0_i32_0 = arith.constant 0 : i32
    return %c0_i32, %arg0 : i32, i32
  }
  func.func @transform_7(%arg0: i32) -> (i32, i32, i32) {
    %c0_i32 = arith.constant 0 : i32
    %c0_i32_0 = arith.constant 0 : i32
    %c0_i32_1 = arith.constant 0 : i32
    return %arg0, %c0_i32, %c0_i32_0 : i32, i32, i32
  }
}

</mosaic_0001>

<bundles_post_ra>
// kernel: tpu_custom_call.1
= control target key start
LH: loop header
LB: loop body
LE: loop exit
PB: predicated region body
PF: predicated region fallthrough
CT: control target
= control target key end

     0   :  { %s4188_s0 = inlined_call_operand.hbm [shape: f32[1536,128], index: 0, kind: input, shape index: {}]   ;;  %s4189_s1 = inlined_call_operand.vmem [shape: f32[1,128], index: 1, kind: input, shape index: {}]   ;;  %s4190_s2 = inlined_call_operand.<no memory space> [shape: f32[1,1], index: 2, kind: input, shape index: {}]   ;;  %s4191_s3 = inlined_call_operand.hbm [shape: f32[128,128], index: 3, kind: input, shape index: {}]   ;;  %s4192_s4 = inlined_call_operand.hbm [shape: f32[128,128], index: 4, kind: input, shape index: {}]   ;;  %s4193_s5 = inlined_call_operand.hbm [shape: f32[1536,128], index: 5, kind: output, shape index: {0}]   ;;  %s4194_s6 = inlined_call_operand.hbm [shape: f32[1,1536], index: 6, kind: output, shape index: {1}]   ;;  %s4195_s7 = inlined_call_operand.hbm [shape: f32[3,8,128], index: 7, kind: output, shape index: {2}]  }
   0x1   :  { %13 = sst [smem:[#allocation2]] %s4190_s2 }
   0x2   :  { %14 = vsyncpa [#allocation4], 0 }
   0x3   :  { %16 = vsyncpa [#allocation4 + $0x1], 0 }
   0x4   :  { %17 = vsyncpa [#allocation7], 0 }
   0x5   :  { %18 = vsyncpa [#allocation5], 0 }
   0x6   :  { %20 = vsyncpa [#allocation5 + $0x1], 0 }
   0x7   :  { %21 = vsyncpa [#allocation11], 0 }
   0x8   :  { %23 = vsyncpa [#allocation11 + $0x1], 0  ;;  %s3335_s26 = smov 0   ;;  %s3337_s27 = smov 0  }
   0x9   :  { %s3339_s28 = smov 0   ;;  %s3341_s29 = smov 0  }
   0xa LB: > { %s3356_s2 = sadd.s32 4294967295, %s3279_s29   ;;  %s4199_s30 = sadd.s32 4294967294, %s3279_s29   ;;  %s3279_s29 = sphi %s3341_s29, %s4216_s29   ;;  %s3275_s28 = sphi %s3339_s28, %s4215_s28   ;;  %s3271_s27 = sphi %s3337_s27, %s4214_s27   ;;  %s3267_s26 = sphi %s3335_s26, %s4213_s26  }
   0xb   : > { %p49_p0 = scmp.ne.s32.totalorder %s3271_s27, %s3267_s26  ;;  %p4196_p1 = scmp.eq.s32.totalorder %s3356_s2, 0 }
   0xc   : > { %p163_p3 = scmp.eq.s32.totalorder %s4199_s30, 2  ;;  %p2174_p5 = scmp.ge.s32.totalorder %s3279_s29, 1 }
   0xd   : > { %p3367_p4 = por %p4196_p1, %p49_p0  ;;  %p222_p7 = scmp.lt.s32.totalorder %s3279_s29, 4 }
   0xe   : > { %p3372_p6 = por %p163_p3, %p49_p0  ;;  %s3281_s11 = smov [#allocation6]  }
   0xf   : > { %s4200_s8 = scalar_select %p3367_p4, 1, 0 }
  0x10   : > { %s4201_s9 = scalar_select %p3372_p6, 1, 0 }
  0x11   : > { %p3377_p8 = pnand %p2174_p5, %p222_p7  ;;  %s240_s12 = sshll.u32 %s3281_s11, 4  ;;  %s241_s12 = int_to_ptr.vmem [resolvable:$true] %s240_s12 }
  0x12   : > { %s3282_s14 = smov [#allocation8]   ;;  %s3063_s18 = scalar_lea.hbm %s4191_s3, 2048 }
  0x13   : > { %s4202_s10 = scalar_select %p3377_p8, 1, 0 }
  0x14   : > { %p2829_p9 = pneg %p3377_p8  ;;  %s253_s15 = sshll.u32 %s3282_s14, 4  ;;  %s3389_s15 = int_to_ptr.vmem [resolvable:$true] %s253_s15 }
  0x15   : > { %p3064_p11 = scmp.ne.s32.totalorder %s4191_s3, %s3063_s18  ;;  %p3070_p3 = scmp.lt.u32.totalorder %s3063_s18, %s4191_s3 }
  0x16   : > { %p3385_p10 = pnand %p2829_p9, %p4196_p1 }
  0x18   : > { %p3065_p12 = pneg %p3385_p10 }
  0x1a   : > { %p3066_p13 = pnand %p3065_p12, %p3064_p11 }
  0x1c   : > { %p3067_p0 = pneg %p3066_p13 }
  0x1e   : > { %p3072_p5 = pnand %p3070_p3, %p3067_p0 }
  0x20   : > { %3075 = shalt.err (!%p3072_p5)
}
  0x21   : > { %s3076_s23 = scalar_lea.vmem %s241_s12, 2048  ;;  %p3084_p2 = scmp.lt.s32.totalorder %s241_s12, %s241_s12 }
  0x22   : > { %p3077_p7 = scmp.ne.s32.totalorder %s241_s12, %s3076_s23  ;;  %p3085_p6 = scmp.lt.s32.totalorder %s3076_s23, %s3076_s23 }
  0x24   : > { %p3079_p9 = pnand %p3077_p7, %p3065_p12  ;;  %p3086_p4 = por %p3085_p6, %p3084_p2 }
  0x26   : > { %p3080_p1 = pneg %p3079_p9 }
  0x28   : > { %p3087_p8 = pnand %p3086_p4, %p3080_p1 }
  0x2a   : > { %3090 = shalt.err (!%p3087_p8)
}
  0x2b   : > { %s3283_s24 = smov 128   ;;  %s3284_s25 = smov 8  }
  0x2c   : > { %2832 = dma.hbm_to_vmem [thread:$0]  (!%p3385_p10), %s4191_s3, 2048, %s241_s12, [#allocation7], %s3283_s24, %s3283_s24, %s3284_s25  }
  0x2d   : > { %s3091_s18 = scalar_lea.hbm %s4192_s4, 2048 }
  0x2e   : > { %p3092_p1 = scmp.ne.s32.totalorder %s4192_s4, %s3091_s18  ;;  %p3098_p6 = scmp.lt.u32.totalorder %s3091_s18, %s4192_s4 }
  0x30   : > { %p3094_p2 = pnand %p3092_p1, %p3065_p12 }
  0x32   : > { %p3095_p4 = pneg %p3094_p2 }
  0x34   : > { %p3100_p8 = pnand %p3098_p6, %p3095_p4 }
  0x36   : > { %3103 = shalt.err (!%p3100_p8)
}
  0x37   : > { %s3104_s12 = scalar_lea.vmem %s3389_s15, 2048  ;;  %p3112_p3 = scmp.lt.s32.totalorder %s3389_s15, %s3389_s15 }
  0x38   : > { %p3105_p11 = scmp.ne.s32.totalorder %s3389_s15, %s3104_s12  ;;  %p3113_p5 = scmp.lt.s32.totalorder %s3104_s12, %s3104_s12 }
  0x3a   : > { %p3107_p13 = pnand %p3105_p11, %p3065_p12  ;;  %p3114_p7 = por %p3113_p5, %p3112_p3 }
  0x3c   : > { %p3108_p0 = pneg %p3107_p13 }
  0x3e   : > { %p3115_p9 = pnand %p3114_p7, %p3108_p0 }
  0x40   : > { %3118 = shalt.err (!%p3115_p9)
}
  0x41   : > { %2835 = dma.hbm_to_vmem [thread:$0]  (!%p3385_p10), %s4192_s4, 2048, %s3389_s15, [#allocation7], %s3283_s24, %s3283_s24, %s3284_s25  }
  0x42   : > { %s3445_s13 = sadd.s32 1, %s3279_s29   ;;  %s36_s14 = sadd.s32 1, %s3275_s28 }
  0x43   : > { %s33_s16 = ssub.s32 %s3279_s29, %s3445_s13  ;;  %p43_p12 = scmp.ne.s32.totalorder %s3275_s28, %s3271_s27 }
  0x44   : > { %p34_p1 = scmp.eq.s32.totalorder %s33_s16, 0  ;;  %p44_p2 = scmp.eq.s32.totalorder %s3279_s29, 0 }
  0x45   : > { %p4204_p4 = scmp.eq.s32.totalorder %s3356_s2, 2  ;;  %p2852_p8 = scmp.lt.s32.totalorder %s3279_s29, 3 }
  0x46   : > { %s3461_s18 = scalar_select %p34_p1, %s3275_s28, %s36_s14  }
  0x47   : > { %p3455_p6 = por %p4204_p4, %p43_p12  ;;  %p45_p11 = por %p44_p2, %p43_p12 }
  0x48   : > { %s267_s19 = sand.u32 1, %s3275_s28   ;;  %s2198_s15 = sshll.u32 %s3279_s29, 13 }
  0x49   : > { %s2178_s20 = sshll.u32 %s267_s19, 9  ;;  %s3468_s12 = scalar_lea.hbm %s4188_s0, %s2198_s15 }
  0x4a   : > { %s271_s23 = scalar_lea.vmem [#allocation3], %s2178_s20  ;;  %p3472_p10 = pnand %p2852_p8, %p45_p11 }
  0x4b   : > { %s278_s11 = sshll.u32 %s271_s23, 4  ;;  %s3476_s16 = scalar_lea.sflag [#allocation4], %s267_s19  ;;  %s3470_s11 = int_to_ptr.vmem [resolvable:$true] %s278_s11 }
  0x4c   : > { %s3119_s30 = scalar_lea.hbm %s3468_s12, 8192  ;;  %p3121_p0 = pneg %p3472_p10 }
  0x4d   : > { %p3120_p13 = scmp.ne.s32.totalorder %s3468_s12, %s3119_s30  ;;  %s3124_s21 = scalar_lea.hbm %s4188_s0, 24576 }
  0x4e   : > { %p3125_p7 = scmp.lt.u32.totalorder %s3468_s12, %s4188_s0  ;;  %p3126_p9 = scmp.lt.u32.totalorder %s3124_s21, %s3119_s30 }
  0x4f   : > { %p3122_p3 = pnand %p3121_p0, %p3120_p13  ;;  %p3128_p1 = scmp.lt.u32.totalorder %s3119_s30, %s3468_s12 }
  0x50   : > { %p3127_p12 = por %p3126_p9, %p3125_p7 }
  0x51   : > { %p3123_p5 = pneg %p3122_p3 }
  0x52   : > { %p3129_p2 = por %p3128_p1, %p3127_p12 }
  0x54   : > { %p3130_p4 = pnand %p3129_p2, %p3123_p5 }
  0x56   : > { %3133 = shalt.err (!%p3130_p4)
}
  0x57   : > { %s3134_s19 = scalar_lea.vmem %s3470_s11, 8192  ;;  %s3285_s20 = smov [#allocation3]  }
  0x58   : > { %p3135_p8 = scmp.ne.s32.totalorder %s3470_s11, %s3134_s19  ;;  %s3139_s15 = sshll.u32 %s3285_s20, 4  ;;  %s3140_s15 = int_to_ptr.vmem [resolvable:$false] %s3139_s15 }
  0x59   : > { %s3141_s22 = scalar_lea.vmem %s3140_s15, 16384  ;;  %p3142_p3 = scmp.lt.s32.totalorder %s3470_s11, %s3140_s15 }
  0x5a   : > { %p3137_p11 = pnand %p3135_p8, %p3121_p0  ;;  %p3143_p7 = scmp.lt.s32.totalorder %s3141_s22, %s3134_s19 }
  0x5c   : > { %p3138_p13 = pneg %p3137_p11  ;;  %p3144_p9 = por %p3143_p7, %p3142_p3 }
  0x5e   : > { %p3145_p12 = pnand %p3144_p9, %p3138_p13 }
  0x60   : > { %3148 = shalt.err (!%p3145_p12)
}
  0x61   : > { %2839 = dma.hbm_to_vmem [thread:$0]  (!%p3472_p10), %s3468_s12, 8192, %s3470_s11, %s3476_s16, %s3283_s24, %s3283_s24, %s3284_s25  }
  0x62   : > { %p4207_p0 = scmp.ne.s32.totalorder %s4202_s10, 0 }
  0x63   : > { %s3510_s30 = sand.u32 (!%p4207_p0), 1, %s3271_s27   ;;  %p4208_p5 = scmp.ne.s32.totalorder (!%p4207_p0), %s4200_s8, 0 }
  0x64   : > { %290 = sbr.rel (%p4207_p0) target bundleno = 607 (0x25f), region = 40  ;;  %s2182_s21 = sshll.u32 (!%p4207_p0), %s3510_s30, 9 }
  0x65   : > { %s293_s23 = scalar_lea.sflag (!%p4207_p0), [#allocation4], %s3510_s30  ;;  %s3516_s14 = scalar_lea.vmem (!%p4207_p0), [#allocation3], %s2182_s21 }
  0x6b   : > { %3250 = dma.done.wait (%p4208_p5), %s293_s23, 8192  }
  0x6c   : > { %3252 = vsyncadd (%p4208_p5), %s293_s23, 4294959104  ;;  %p4209_p10 = scmp.eq.s32.totalorder %s3356_s2, 0 }
  0x6e   : > { %3254 = dma.done.wait (%p4209_p10), [#allocation7], 4096   ;;  %p4210_p1 = pmov %p4209_p10 }
  0x6f   : > { %v364_v0 = vld [vmem:[%s3516_s14 + $0x80] sm:$0xff]  ;;  %v365_v1 = vld [vmem:[%s3516_s14 + $0x88] sm:$0xff]  ;;  %v366_v16 = vld [vmem:[%s3516_s14 + $0x90] sm:$0xff]  ;;  %s3650_s8 = scalar_lea.vmem [#allocation9], %s2182_s21  ;;  %s733_s25 = sld [smem:[#allocation2]] }
  0x70   : > { %3256 = vsyncadd (%p4210_p1), [#allocation7], 4294963200  ;;  %v396_v2 = vld [vmem:[%s3516_s14 + $0x180] sm:$0xff]  ;;  %v428_v3 = vmul.f32 0.5, %v364_v0  ;;  %v429_v4 = vmul.f32 0.5, %v365_v1  ;;  %v2685_v5 = vpack.c.bf16 %v365_v1, %v364_v0  ;;  %v397_v6 = vld [vmem:[%s3516_s14 + $0x188] sm:$0xff] }
  0x71   : > { %v460_v7 = vmul.f32 0.5, %v396_v2  ;;  %v3531_v8 = vld [vmem:[%s3516_s14] sm:$0xff]  ;;  %v349_v9 = vld [vmem:[%s3516_s14 + $0x8] sm:$0xff]  ;;  %v461_v10 = vmul.f32 0.5, %v397_v6  ;;  %v2717_v11 = vpack.c.bf16 %v397_v6, %v396_v2  ;;  %v367_v20 = vld [vmem:[%s3516_s14 + $0x98] sm:$0xff]  ;;  %v430_v24 = vmul.f32 0.5, %v366_v16 }
  0x72   : > { %v412_v12 = vmul.f32 0.5, %v3531_v8  ;;  %v413_v13 = vmul.f32 0.5, %v349_v9  ;;  %v380_v14 = vld [vmem:[%s3516_s14 + $0x100] sm:$0xff]  ;;  %v381_v15 = vld [vmem:[%s3516_s14 + $0x108] sm:$0xff]  ;;  %2895 = vtanh.f32 %v428_v3  ;;  %2686 = vmatprep.subr.bf16.mxu0 %v2685_v5  ;;  %v2687_v17 = vpack.c.bf16 %v349_v9, %v3531_v8  ;;  %v398_v21 = vld [vmem:[%s3516_s14 + $0x190] sm:$0xff]  ;;  %s2186_s12 = sshll.u32 %s3510_s30, 2 }
  0x73   : > { %v444_v18 = vmul.f32 0.5, %v380_v14  ;;  %v445_v19 = vmul.f32 0.5, %v381_v15  ;;  %v399_v22 = vld [vmem:[%s3516_s14 + $0x198] sm:$0xff]  ;;  %2897 = vtanh.f32 %v429_v4  ;;  %2718 = vmatprep.subr.bf16.mxu1 %v2717_v11  ;;  %v2719_v23 = vpack.c.bf16 %v381_v15, %v380_v14  ;;  %v350_v26 = vld [vmem:[%s3516_s14 + $0x10] sm:$0xff]  ;;  %v368_v36 = vld [vmem:[%s3516_s14 + $0xa0] sm:$0xff]  ;;  %s337_s11 = scalar_lea.vmem [#allocation10], %s2186_s12 }
  0x74   : > { %v431_v25 = vmul.f32 0.5, %v367_v20  ;;  %v351_v27 = vld [vmem:[%s3516_s14 + $0x18] sm:$0xff]  ;;  %2899 = vtanh.f32 %v460_v7  ;;  %2688 = vmatpush3.bf16.xpose.msra.mxu0 %v2687_v17  ;;  %v2689_v28 = vpack.c.bf16 %v367_v20, %v366_v16  ;;  %v462_v29 = vmul.f32 0.5, %v398_v21  ;;  %v382_v31 = vld [vmem:[%s3516_s14 + $0x110] sm:$0xff]  ;;  %v369_v37 = vld [vmem:[%s3516_s14 + $0xa8] sm:$0xff]  ;;  %s1974_s16 = sand.u32 1, %s3356_s2  }
  0x75   : > { %v463_v30 = vmul.f32 0.5, %v399_v22  ;;  %v383_v32 = vld [vmem:[%s3516_s14 + $0x118] sm:$0xff]  ;;  %2901 = vtanh.f32 %v461_v10  ;;  %2720 = vmatpush3.bf16.xpose.msra.mxu1 %v2719_v23  ;;  %v2721_v33 = vpack.c.bf16 %v399_v22, %v398_v21  ;;  %v414_v34 = vmul.f32 0.5, %v350_v26  ;;  %v400_v41 = vld [vmem:[%s3516_s14 + $0x1a0] sm:$0xff]  ;;  %v401_v42 = vld [vmem:[%s3516_s14 + $0x1a8] sm:$0xff]  ;;  %s2200_s19 = sshll.u32 %s3356_s2, 6 }
  0x76   : > { %v3546_v35 = vmul.f32 0.5, %v351_v27  ;;  %2903 = vtanh.f32 %v412_v12  ;;  %2690 = vmatprep.subr.bf16.mxu0 %v2689_v28  ;;  %v2691_v38 = vpack.c.bf16 %v351_v27, %v350_v26  ;;  %v3550_v39 = vmul.f32 0.5, %v382_v31  ;;  %v3561_v46 = vld [vmem:[%s3516_s14 + $0x20] sm:$0xff]  ;;  %v3564_v47 = vld [vmem:[%s3516_s14 + $0x28] sm:$0xff]  ;;  %v3583_v56 = vld [vmem:[%s3516_s14 + $0xb0] sm:$0xff]  ;;  %s4081_s22 = scalar_lea.hbm %s4194_s6, %s2200_s19  ;;  %s2010_s21 = sshll.u32 %s337_s11, 4  ;;  %s4083_s21 = int_to_ptr.vmem [resolvable:$true] %s2010_s21 }
  0x77   : > { %v3552_v40 = vmul.f32 0.5, %v383_v32  ;;  %2905 = vtanh.f32 %v413_v13  ;;  %2722 = vmatprep.subr.bf16.mxu1 %v2721_v33  ;;  %v2723_v43 = vpack.c.bf16 %v383_v32, %v382_v31  ;;  %v3556_v44 = vmul.f32 0.5, %v368_v36  ;;  %v3571_v51 = vld [vmem:[%s3516_s14 + $0x120] sm:$0xff]  ;;  %v3574_v52 = vld [vmem:[%s3516_s14 + $0x128] sm:$0xff]  ;;  %v3586_v57 = vld [vmem:[%s3516_s14 + $0xb8] sm:$0xff]  ;;  %s2199_s23 = sshll.u32 %s3356_s2, 13 }
  0x78   : > { %v3558_v45 = vmul.f32 0.5, %v369_v37  ;;  %2907 = vtanh.f32 %v444_v18  ;;  %v2693_v48 = vpack.c.bf16 %v369_v37, %v368_v36  ;;  %v3566_v49 = vmul.f32 0.5, %v400_v41  ;;  %v3597_v61 = vld [vmem:[%s3516_s14 + $0x1b0] sm:$0xff]  ;;  %v3600_v62 = vld [vmem:[%s3516_s14 + $0x1b8] sm:$0xff]  ;;  %v3657_v31 = vld [vmem:[%s3516_s14 + $0xc0] sm:$0xff]  ;;  %s3149_s10 = scalar_lea.vmem %s4083_s21, 64 }
  0x79   : > { %v3568_v50 = vmul.f32 0.5, %v401_v42  ;;  %2909 = vtanh.f32 %v445_v19  ;;  %v2725_v53 = vpack.c.bf16 %v401_v42, %v400_v41  ;;  %v3577_v54 = vmul.f32 0.5, %v3561_v46  ;;  %v3611_v2 = vld [vmem:[%s3516_s14 + $0x30] sm:$0xff]  ;;  %v3614_v3 = vld [vmem:[%s3516_s14 + $0x38] sm:$0xff]  ;;  %v3660_v32 = vld [vmem:[%s3516_s14 + $0xc8] sm:$0xff]  ;;  %p3150_p2 = scmp.ne.s32.totalorder %s4083_s21, %s3149_s10  ;;  %s3287_s24 = smov [#allocation10]  }
  0x7a   : > { %v3580_v55 = vmul.f32 0.5, %v3564_v47  ;;  %2911 = vtanh.f32 %v430_v24  ;;  %v2695_v58 = vpack.c.bf16 %v3564_v47, %v3561_v46  ;;  %v3591_v59 = vmul.f32 0.5, %v3571_v51  ;;  %v3635_v17 = vld [vmem:[%s3516_s14 + $0x130] sm:$0xff]  ;;  %v3638_v18 = vld [vmem:[%s3516_s14 + $0x138] sm:$0xff] }
  0x7b   : > { %v3594_v60 = vmul.f32 0.5, %v3574_v52  ;;  %2913 = vtanh.f32 %v431_v25  ;;  %v2727_v63 = vpack.c.bf16 %v3574_v52, %v3571_v51  ;;  %v3605_v0 = vmul.f32 0.5, %v3583_v56  ;;  %p3151_p4 = pnand %p3150_p2, %p3455_p6 }
  0x7c   : > { %v3608_v1 = vmul.f32 0.5, %v3586_v57  ;;  %v2896_v4 = vpop.eup %2895  ;;  %2915 = vtanh.f32 %v462_v29  ;;  %2692 = vmatpush3.bf16.xpose.msra.mxu0 %v2691_v38  ;;  %v2697_v5 = vpack.c.bf16 %v3586_v57, %v3583_v56  ;;  %v3619_v6 = vmul.f32 0.5, %v3597_v61 }
  0x7d   : > { %v3622_v7 = vmul.f32 0.5, %v3600_v62  ;;  %v2898_v9 = vpop.eup %2897  ;;  %v556_v10 = vmul.f32 0.5, %v2896_v4  ;;  %2917 = vtanh.f32 %v463_v30  ;;  %2724 = vmatpush3.bf16.xpose.msra.mxu1 %v2723_v43  ;;  %2694 = vmatprep.subr.bf16.mxu0 %v2693_v48  ;;  %v2729_v11 = vpack.c.bf16 %v3600_v62, %v3597_v61  ;;  %v3680_v48 = vld [vmem:[%s3516_s14 + $0x1c0] sm:$0xff]  ;;  %v3718_v61 = vld [vmem:[%s3516_s14 + $0x48] sm:$0xff]  ;;  %p3152_p8 = pneg %p3151_p4 }
  0x7e   : > { %v3627_v12 = vmul.f32 0.5, %v3611_v2  ;;  %v2900_v13 = vpop.eup %2899  ;;  %v557_v14 = vmul.f32 0.5, %v2898_v9  ;;  %2919 = vtanh.f32 %v414_v34  ;;  %2726 = vmatprep.subr.bf16.mxu1 %v2725_v53  ;;  %v3630_v15 = vmul.f32 0.5, %v3614_v3  ;;  %v3688_v53 = vld [vmem:[%s4189_s1] sm:$0x1] }
  0x7f   : > { %v2699_v16 = vpack.c.bf16 %v3614_v3, %v3611_v2  ;;  %v2902_v19 = vpop.eup %2901  ;;  %v620_v20 = vadd.f32 0.5, %v556_v10  ;;  %v588_v21 = vmul.f32 0.5, %v2900_v13  ;;  %2921 = vtanh.f32 %v3546_v35  ;;  %2233 = vmatprep.mubr.f32.mxu0 %v3688_v53  ;;  %2267 = vmatprep.mubr.f32.mxu1 %v3688_v53  ;;  %v3765_v3 = vld [vmem:[%s3516_s14 + $0xd0] sm:$0xff] }
  0x80   : > { %v3642_v22 = vmul.f32 0.5, %v3635_v17  ;;  %v2904_v23 = vpop.eup %2903  ;;  %v621_v24 = vadd.f32 0.5, %v557_v14  ;;  %v589_v25 = vmul.f32 0.5, %v2902_v19  ;;  %2923 = vtanh.f32 %v3550_v39 }
  0x81   : > { %v3646_v26 = vmul.f32 0.5, %v3638_v18  ;;  %v2906_v27 = vpop.eup %2905  ;;  %684 = vst [vmem:[%s3650_s8 + $0x80] sm:$0xff] %v620_v20  ;;  %v652_v28 = vadd.f32 0.5, %v588_v21  ;;  %v540_v29 = vmul.f32 0.5, %v2904_v23  ;;  %2925 = vtanh.f32 %v3552_v40 }
  0x82   : > { %v2731_v30 = vpack.c.bf16 %v3638_v18, %v3635_v17  ;;  %v2908_v33 = vpop.eup %2907  ;;  %685 = vst [vmem:[%s3650_s8 + $0x88] sm:$0xff] %v621_v24  ;;  %v653_v34 = vadd.f32 0.5, %v589_v25  ;;  %v541_v35 = vmul.f32 0.5, %v2906_v27  ;;  %2927 = vtanh.f32 %v3556_v44  ;;  %v3736_v24 = vld [vmem:[%s3516_s14 + $0x140] sm:$0xff]  ;;  %v3739_v25 = vld [vmem:[%s3516_s14 + $0x148] sm:$0xff] }
  0x83   : > { %v3665_v36 = vmul.f32 0.5, %v3657_v31  ;;  %v2910_v37 = vpop.eup %2909  ;;  %716 = vst [vmem:[%s3650_s8 + $0x180] sm:$0xff] %v652_v28  ;;  %v604_v38 = vadd.f32 0.5, %v540_v29  ;;  %v572_v39 = vmul.f32 0.5, %v2908_v33  ;;  %2929 = vtanh.f32 %v3558_v45  ;;  %v3683_v45 = vld [vmem:[%s3516_s14 + $0x1c8] sm:$0xff] }
  0x84   : > { %v3670_v40 = vmul.f32 0.5, %v3660_v32  ;;  %v2912_v41 = vpop.eup %2911  ;;  %717 = vst [vmem:[%s3650_s8 + $0x188] sm:$0xff] %v653_v34  ;;  %v605_v42 = vadd.f32 0.5, %v541_v35  ;;  %v573_v43 = vmul.f32 0.5, %v2910_v37  ;;  %2931 = vtanh.f32 %v3566_v49  ;;  %2696 = vmatpush3.bf16.xpose.msra.mxu0 %v2695_v58 }
  0x85   : > { %v2701_v44 = vpack.c.bf16 %v3660_v32, %v3657_v31  ;;  %v2914_v4 = vpop.eup %2913  ;;  %668 = vst [vmem:[%s3650_s8] sm:$0xff] %v604_v38  ;;  %v636_v49 = vadd.f32 0.5, %v572_v39  ;;  %v558_v9 = vmul.f32 0.5, %v2912_v41  ;;  %2933 = vtanh.f32 %v3568_v50  ;;  %2728 = vmatpush3.bf16.xpose.msra.mxu1 %v2727_v63  ;;  %2698 = vmatprep.subr.bf16.mxu0 %v2697_v5 }
  0x86   : > { %v3699_v46 = vmul.f32 0.5, %v3680_v48  ;;  %v2916_v47 = vpop.eup %2915  ;;  %669 = vst [vmem:[%s3650_s8 + $0x8] sm:$0xff] %v605_v42  ;;  %v637_v58 = vadd.f32 0.5, %v573_v43  ;;  %v559_v10 = vmul.f32 0.5, %v2914_v4  ;;  %2935 = vtanh.f32 %v3577_v54  ;;  %2730 = vmatprep.subr.bf16.mxu1 %v2729_v11  ;;  %v3715_v54 = vld [vmem:[%s3516_s14 + $0x40] sm:$0xff] }
  0x87   : > { %v3707_v50 = vmul.f32 0.5, %v3683_v45  ;;  %v2918_v51 = vpop.eup %2917  ;;  %700 = vst [vmem:[%s3650_s8 + $0x100] sm:$0xff] %v636_v49  ;;  %v622_v52 = vadd.f32 0.5, %v558_v9  ;;  %v590_v56 = vmul.f32 0.5, %v2916_v47  ;;  %2937 = vtanh.f32 %v3580_v55 }
  0x88   : > { %v2733_v57 = vpack.c.bf16 %v3683_v45, %v3680_v48  ;;  %v2920_v62 = vpop.eup %2919  ;;  %701 = vst [vmem:[%s3650_s8 + $0x108] sm:$0xff] %v637_v58  ;;  %v623_v63 = vadd.f32 0.5, %v559_v10  ;;  %v591_v5 = vmul.f32 0.5, %v2918_v51  ;;  %2939 = vtanh.f32 %v3591_v59  ;;  %v407_v48 = vld [vmem:[%s3516_s14 + $0x1d8] sm:$0xff] }
  0x89   : > { %v3724_v55 = vmul.f32 0.5, %v3715_v54  ;;  %v2922_v11 = vpop.eup %2921  ;;  %686 = vst [vmem:[%s3650_s8 + $0x90] sm:$0xff] %v622_v52  ;;  %v654_v13 = vadd.f32 0.5, %v590_v56  ;;  %v542_v14 = vmul.f32 0.5, %v2920_v62  ;;  %2941 = vtanh.f32 %v3594_v60 }
  0x8a   : > { %v3729_v19 = vmul.f32 0.5, %v3718_v61  ;;  %v2924_v20 = vpop.eup %2923  ;;  %687 = vst [vmem:[%s3650_s8 + $0x98] sm:$0xff] %v623_v63  ;;  %v655_v21 = vadd.f32 0.5, %v591_v5  ;;  %v543_v23 = vmul.f32 0.5, %v2922_v11  ;;  %2943 = vtanh.f32 %v3605_v0 }
  0x8b   : > { %v2703_v59 = vpack.c.bf16 %v3718_v61, %v3715_v54  ;;  %v2926_v27 = vpop.eup %2925  ;;  %718 = vst [vmem:[%s3650_s8 + $0x190] sm:$0xff] %v654_v13  ;;  %v606_v60 = vadd.f32 0.5, %v542_v14  ;;  %v574_v28 = vmul.f32 0.5, %v2924_v20  ;;  %2945 = vtanh.f32 %v3608_v1 }
  0x8c   : > { %v3744_v29 = vmul.f32 0.5, %v3736_v24  ;;  %v2928_v33 = vpop.eup %2927  ;;  %719 = vst [vmem:[%s3650_s8 + $0x198] sm:$0xff] %v655_v21  ;;  %v607_v0 = vadd.f32 0.5, %v543_v23  ;;  %v575_v34 = vmul.f32 0.5, %v2926_v27  ;;  %2947 = vtanh.f32 %v3619_v6  ;;  %2700 = vmatpush3.bf16.xpose.msra.mxu0 %v2699_v16  ;;  %v3768_v6 = vld [vmem:[%s3516_s14 + $0xd8] sm:$0xff] }
  0x8d   : > { %v3752_v35 = vmul.f32 0.5, %v3739_v25  ;;  %v2930_v1 = vpop.eup %2929  ;;  %670 = vst [vmem:[%s3650_s8 + $0x10] sm:$0xff] %v606_v60  ;;  %v638_v37 = vadd.f32 0.5, %v574_v28  ;;  %v560_v38 = vmul.f32 0.5, %v2928_v33  ;;  %2949 = vtanh.f32 %v3622_v7  ;;  %2732 = vmatpush3.bf16.xpose.msra.mxu1 %v2731_v30  ;;  %2702 = vmatprep.subr.bf16.mxu0 %v2701_v44  ;;  %v406_v44 = vld [vmem:[%s3516_s14 + $0x1d0] sm:$0xff] }
  0x8e   : > { %v2735_v2 = vpack.c.bf16 %v3739_v25, %v3736_v24  ;;  %v2932_v16 = vpop.eup %2931  ;;  %671 = vst [vmem:[%s3650_s8 + $0x18] sm:$0xff] %v607_v0  ;;  %v639_v39 = vadd.f32 0.5, %v575_v34  ;;  %v561_v7 = vmul.f32 0.5, %v2930_v1  ;;  %2951 = vtanh.f32 %v3627_v12  ;;  %2734 = vmatprep.subr.bf16.mxu1 %v2733_v57  ;;  %v3800_v57 = vld [vmem:[%s3516_s14 + $0x58] sm:$0xff] }
  0x8f   : > { %v3773_v17 = vmul.f32 0.5, %v3765_v3  ;;  %v2934_v18 = vpop.eup %2933  ;;  %702 = vst [vmem:[%s3650_s8 + $0x110] sm:$0xff] %v638_v37  ;;  %v624_v30 = vadd.f32 0.5, %v560_v38  ;;  %v592_v31 = vmul.f32 0.5, %v2932_v16  ;;  %2953 = vtanh.f32 %v3630_v15  ;;  %v3836_v38 = vld [vmem:[%s3516_s14 + $0xe0] sm:$0xff] }
  0x90   : > { %v3778_v32 = vmul.f32 0.5, %v3768_v6  ;;  %v2936_v41 = vpop.eup %2935  ;;  %703 = vst [vmem:[%s3650_s8 + $0x118] sm:$0xff] %v639_v39  ;;  %v625_v42 = vadd.f32 0.5, %v561_v7  ;;  %v593_v12 = vmul.f32 0.5, %v2934_v18  ;;  %2955 = vtanh.f32 %v3642_v22 }
  0x91   : > { %v2705_v43 = vpack.c.bf16 %v3768_v6, %v3765_v3  ;;  %v2938_v45 = vpop.eup %2937  ;;  %688 = vst [vmem:[%s3650_s8 + $0xa0] sm:$0xff] %v624_v30  ;;  %v656_v4 = vadd.f32 0.5, %v592_v31  ;;  %v544_v15 = vmul.f32 0.5, %v2936_v41  ;;  %2957 = vtanh.f32 %v3646_v26  ;;  %v3797_v26 = vld [vmem:[%s3516_s14 + $0x50] sm:$0xff] }
  0x92   : > { %v3788_v49 = vmul.f32 0.5, %v406_v44  ;;  %v2940_v9 = vpop.eup %2939  ;;  %689 = vst [vmem:[%s3650_s8 + $0xa8] sm:$0xff] %v625_v42  ;;  %v657_v22 = vadd.f32 0.5, %v593_v12  ;;  %v545_v47 = vmul.f32 0.5, %v2938_v45  ;;  %2959 = vtanh.f32 %v3665_v36 }
  0x93   : > { %v3792_v58 = vmul.f32 0.5, %v407_v48  ;;  %v2942_v10 = vpop.eup %2941  ;;  %720 = vst [vmem:[%s3650_s8 + $0x1a0] sm:$0xff] %v656_v4  ;;  %v608_v51 = vadd.f32 0.5, %v544_v15  ;;  %v576_v52 = vmul.f32 0.5, %v2940_v9  ;;  %2961 = vtanh.f32 %v3670_v40 }
  0x94   : > { %v2737_v56 = vpack.c.bf16 %v407_v48, %v406_v44  ;;  %v2944_v62 = vpop.eup %2943  ;;  %721 = vst [vmem:[%s3650_s8 + $0x1a8] sm:$0xff] %v657_v22  ;;  %v609_v63 = vadd.f32 0.5, %v545_v47  ;;  %v577_v5 = vmul.f32 0.5, %v2942_v10  ;;  %2963 = vtanh.f32 %v3699_v46  ;;  %2704 = vmatpush3.bf16.xpose.msra.mxu0 %v2703_v59  ;;  %v3820_v59 = vld [vmem:[%s3516_s14 + $0x150] sm:$0xff]  ;;  %v3855_v44 = vld [vmem:[%s3516_s14 + $0x1e8] sm:$0xff] }
  0x95   : > { %v3808_v36 = vmul.f32 0.5, %v3797_v26  ;;  %v2946_v40 = vpop.eup %2945  ;;  %672 = vst [vmem:[%s3650_s8 + $0x20] sm:$0xff] %v608_v51  ;;  %v640_v11 = vadd.f32 0.5, %v576_v52  ;;  %v562_v13 = vmul.f32 0.5, %v2944_v62  ;;  %2965 = vtanh.f32 %v3707_v50  ;;  %2736 = vmatpush3.bf16.xpose.msra.mxu1 %v2735_v2  ;;  %2706 = vmatprep.subr.bf16.mxu0 %v2705_v43  ;;  %v3823_v50 = vld [vmem:[%s3516_s14 + $0x158] sm:$0xff]  ;;  %v3839_v2 = vld [vmem:[%s3516_s14 + $0xe8] sm:$0xff] }
  0x96   : > { %v3813_v46 = vmul.f32 0.5, %v3800_v57  ;;  %v2948_v14 = vpop.eup %2947  ;;  %673 = vst [vmem:[%s3650_s8 + $0x28] sm:$0xff] %v609_v63  ;;  %v641_v20 = vadd.f32 0.5, %v577_v5  ;;  %v563_v21 = vmul.f32 0.5, %v2946_v40  ;;  %2967 = vtanh.f32 %v3724_v55  ;;  %2738 = vmatprep.subr.bf16.mxu1 %v2737_v56  ;;  %v3852_v43 = vld [vmem:[%s3516_s14 + $0x1e0] sm:$0xff]  ;;  %v3871_v56 = vld [vmem:[%s3516_s14 + $0x68] sm:$0xff] }
  0x97   : > { %v2707_v23 = vpack.c.bf16 %v3800_v57, %v3797_v26  ;;  %v2950_v24 = vpop.eup %2949  ;;  %704 = vst [vmem:[%s3650_s8 + $0x120] sm:$0xff] %v640_v11  ;;  %v626_v25 = vadd.f32 0.5, %v562_v13  ;;  %v594_v27 = vmul.f32 0.5, %v2948_v14  ;;  %2969 = vtanh.f32 %v3729_v19  ;;  %v3868_v52 = vld [vmem:[%s3516_s14 + $0x60] sm:$0xff] }
  0x98   : > { %v454_v60 = vmul.f32 0.5, %v3820_v59  ;;  %v2952_v55 = vpop.eup %2951  ;;  %705 = vst [vmem:[%s3650_s8 + $0x128] sm:$0xff] %v641_v20  ;;  %v627_v28 = vadd.f32 0.5, %v563_v21  ;;  %v595_v33 = vmul.f32 0.5, %v2950_v24  ;;  %2971 = vtanh.f32 %v3744_v29  ;;  %v3881_v24 = vld [vmem:[%s3516_s14 + $0x160] sm:$0xff] }
  0x99   : > { %v455_v0 = vmul.f32 0.5, %v3823_v50  ;;  %v2954_v34 = vpop.eup %2953  ;;  %690 = vst [vmem:[%s3650_s8 + $0xb0] sm:$0xff] %v626_v25  ;;  %v658_v1 = vadd.f32 0.5, %v594_v27  ;;  %v546_v37 = vmul.f32 0.5, %v2952_v55  ;;  %2973 = vtanh.f32 %v3752_v35  ;;  %v3884_v25 = vld [vmem:[%s3516_s14 + $0x168] sm:$0xff] }
  0x9a   : > { %v2739_v19 = vpack.c.bf16 %v3823_v50, %v3820_v59  ;;  %v2956_v16 = vpop.eup %2955  ;;  %691 = vst [vmem:[%s3650_s8 + $0xb8] sm:$0xff] %v627_v28  ;;  %v659_v29 = vadd.f32 0.5, %v595_v33  ;;  %v547_v39 = vmul.f32 0.5, %v2954_v34  ;;  %2975 = vtanh.f32 %v3773_v17 }
  0x9b   : > { %v440_v7 = vmul.f32 0.5, %v3836_v38  ;;  %v2958_v18 = vpop.eup %2957  ;;  %722 = vst [vmem:[%s3650_s8 + $0x1b0] sm:$0xff] %v658_v1  ;;  %v610_v35 = vadd.f32 0.5, %v546_v37  ;;  %v578_v30 = vmul.f32 0.5, %v2956_v16  ;;  %2977 = vtanh.f32 %v3778_v32 }
  0x9c   : > { %v441_v31 = vmul.f32 0.5, %v3839_v2  ;;  %v2960_v41 = vpop.eup %2959  ;;  %723 = vst [vmem:[%s3650_s8 + $0x1b8] sm:$0xff] %v659_v29  ;;  %v611_v42 = vadd.f32 0.5, %v547_v39  ;;  %v579_v12 = vmul.f32 0.5, %v2958_v18  ;;  %2979 = vtanh.f32 %v3788_v49  ;;  %2708 = vmatpush3.bf16.xpose.msra.mxu0 %v2707_v23  ;;  %v3894_v39 = vld [vmem:[%s3516_s14 + $0xf0] sm:$0xff] }
  0x9d   : > { %v2709_v17 = vpack.c.bf16 %v3839_v2, %v3836_v38  ;;  %v2962_v48 = vpop.eup %2961  ;;  %674 = vst [vmem:[%s3650_s8 + $0x30] sm:$0xff] %v610_v35  ;;  %v642_v32 = vadd.f32 0.5, %v578_v30  ;;  %v564_v45 = vmul.f32 0.5, %v2960_v41  ;;  %2981 = vtanh.f32 %v3792_v58  ;;  %2740 = vmatpush3.bf16.xpose.msra.mxu1 %v2739_v19 }
  0x9e   : > { %v472_v4 = vmul.f32 0.5, %v3852_v43  ;;  %v2964_v15 = vpop.eup %2963  ;;  %675 = vst [vmem:[%s3650_s8 + $0x38] sm:$0xff] %v611_v42  ;;  %v643_v49 = vadd.f32 0.5, %v579_v12  ;;  %v565_v9 = vmul.f32 0.5, %v2962_v48  ;;  %2983 = vtanh.f32 %v3808_v36 }
  0x9f   : > { %2710 = vmatprep.subr.bf16.mxu0 %v2709_v17  ;;  %v473_v22 = vmul.f32 0.5, %v3855_v44  ;;  %v2966_v47 = vpop.eup %2965  ;;  %706 = vst [vmem:[%s3650_s8 + $0x130] sm:$0xff] %v642_v32  ;;  %v628_v10 = vadd.f32 0.5, %v564_v45  ;;  %v596_v58 = vmul.f32 0.5, %v2964_v15  ;;  %2985 = vtanh.f32 %v3813_v46  ;;  %v3907_v15 = vld [vmem:[%s3516_s14 + $0x1f0] sm:$0xff] }
  0xa0   : > { %v2741_v51 = vpack.c.bf16 %v3855_v44, %v3852_v43  ;;  %v2968_v62 = vpop.eup %2967  ;;  %707 = vst [vmem:[%s3650_s8 + $0x138] sm:$0xff] %v643_v49  ;;  %v629_v63 = vadd.f32 0.5, %v565_v9  ;;  %v597_v5 = vmul.f32 0.5, %v2966_v47  ;;  %2987 = vtanh.f32 %v454_v60  ;;  %v3910_v49 = vld [vmem:[%s3516_s14 + $0x1f8] sm:$0xff] }
  0xa1   : > { %v424_v36 = vmul.f32 0.5, %v3868_v52  ;;  %v2970_v40 = vpop.eup %2969  ;;  %692 = vst [vmem:[%s3650_s8 + $0xc0] sm:$0xff] %v628_v10  ;;  %v660_v11 = vadd.f32 0.5, %v596_v58  ;;  %v548_v13 = vmul.f32 0.5, %v2968_v62  ;;  %2989 = vtanh.f32 %v455_v0 }
  0xa2   : > { %2742 = vmatprep.subr.bf16.mxu1 %v2741_v51  ;;  %v425_v46 = vmul.f32 0.5, %v3871_v56  ;;  %v2972_v14 = vpop.eup %2971  ;;  %693 = vst [vmem:[%s3650_s8 + $0xc8] sm:$0xff] %v629_v63  ;;  %v661_v20 = vadd.f32 0.5, %v597_v5  ;;  %v549_v21 = vmul.f32 0.5, %v2970_v40  ;;  %2991 = vtanh.f32 %v440_v7  ;;  %v3897_v7 = vld [vmem:[%s3516_s14 + $0xf8] sm:$0xff] }
  0xa3   : > { %v2711_v23 = vpack.c.bf16 %v3871_v56, %v3868_v52  ;;  %v2974_v27 = vpop.eup %2973  ;;  %724 = vst [vmem:[%s3650_s8 + $0x1c0] sm:$0xff] %v660_v11  ;;  %v612_v60 = vadd.f32 0.5, %v548_v13  ;;  %v580_v55 = vmul.f32 0.5, %v2972_v14  ;;  %2993 = vtanh.f32 %v441_v31  ;;  %v3920_v13 = vld [vmem:[%s3516_s14 + $0x70] sm:$0xff] }
  0xa4   : > { %v456_v28 = vmul.f32 0.5, %v3881_v24  ;;  %v2976_v33 = vpop.eup %2975  ;;  %725 = vst [vmem:[%s3650_s8 + $0x1c8] sm:$0xff] %v661_v20  ;;  %v613_v0 = vadd.f32 0.5, %v549_v21  ;;  %v581_v34 = vmul.f32 0.5, %v2974_v27  ;;  %2995 = vtanh.f32 %v472_v4 }
  0xa5   : > { %2712 = vmatpush3.bf16.xpose.msra.mxu0 %v2711_v23  ;;  %v457_v1 = vmul.f32 0.5, %v3884_v25  ;;  %v2978_v37 = vpop.eup %2977  ;;  %676 = vst [vmem:[%s3650_s8 + $0x40] sm:$0xff] %v612_v60  ;;  %v644_v19 = vadd.f32 0.5, %v580_v55  ;;  %v566_v16 = vmul.f32 0.5, %v2976_v33  ;;  %2997 = vtanh.f32 %v473_v22  ;;  %v3930_v33 = vld [vmem:[%s3516_s14 + $0x170] sm:$0xff] }
  0xa6   : > { %v2743_v29 = vpack.c.bf16 %v3884_v25, %v3881_v24  ;;  %v2980_v18 = vpop.eup %2979  ;;  %677 = vst [vmem:[%s3650_s8 + $0x48] sm:$0xff] %v613_v0  ;;  %v645_v35 = vadd.f32 0.5, %v581_v34  ;;  %v567_v30 = vmul.f32 0.5, %v2978_v37  ;;  %2999 = vtanh.f32 %v424_v36  ;;  %v3933_v0 = vld [vmem:[%s3516_s14 + $0x178] sm:$0xff] }
  0xa7   : > { %v442_v31 = vmul.f32 0.5, %v3894_v39  ;;  %v2982_v41 = vpop.eup %2981  ;;  %708 = vst [vmem:[%s3650_s8 + $0x140] sm:$0xff] %v644_v19  ;;  %v630_v42 = vadd.f32 0.5, %v566_v16  ;;  %v598_v12 = vmul.f32 0.5, %v2980_v18  ;;  %3001 = vtanh.f32 %v425_v46  ;;  %v3923_v46 = vld [vmem:[%s3516_s14 + $0x78] sm:$0xff]  ;;  %v911_v16 = vld [vmem:[#allocation6] sm:$0xff] }
  0xa8   : > { %2744 = vmatpush3.bf16.xpose.msra.mxu1 %v2743_v29  ;;  %v443_v17 = vmul.f32 0.5, %v3897_v7  ;;  %v2984_v48 = vpop.eup %2983  ;;  %709 = vst [vmem:[%s3650_s8 + $0x148] sm:$0xff] %v645_v35  ;;  %v631_v32 = vadd.f32 0.5, %v567_v30  ;;  %v599_v45 = vmul.f32 0.5, %v2982_v41  ;;  %3003 = vtanh.f32 %v456_v28  ;;  %v912_v29 = vld [vmem:[#allocation6 + $0x8] sm:$0xff]  ;;  %v1376_v41 = vld [vmem:[#allocation8] sm:$0xff] }
  0xa9   : > { %v2713_v4 = vpack.c.bf16 %v3897_v7, %v3894_v39  ;;  %v2986_v9 = vpop.eup %2985  ;;  %694 = vst [vmem:[%s3650_s8 + $0xd0] sm:$0xff] %v630_v42  ;;  %v662_v22 = vadd.f32 0.5, %v598_v12  ;;  %v550_v47 = vmul.f32 0.5, %v2984_v48  ;;  %3005 = vtanh.f32 %v457_v1  ;;  %v1377_v42 = vld [vmem:[#allocation8 + $0x8] sm:$0xff] }
  0xaa   : > { %v474_v10 = vmul.f32 0.5, %v3907_v15  ;;  %v2988_v58 = vpop.eup %2987  ;;  %695 = vst [vmem:[%s3650_s8 + $0xd8] sm:$0xff] %v631_v32  ;;  %v663_v51 = vadd.f32 0.5, %v599_v45  ;;  %v551_v62 = vmul.f32 0.5, %v2986_v9  ;;  %3007 = vtanh.f32 %v442_v31 }
  0xab   : > { %2714 = vmatprep.subr.bf16.mxu0 %v2713_v4  ;;  %v475_v63 = vmul.f32 0.5, %v3910_v49  ;;  %v2990_v5 = vpop.eup %2989  ;;  %726 = vst [vmem:[%s3650_s8 + $0x1d0] sm:$0xff] %v662_v22  ;;  %v614_v36 = vadd.f32 0.5, %v550_v47  ;;  %v582_v40 = vmul.f32 0.5, %v2988_v58  ;;  %3009 = vtanh.f32 %v443_v17 }
  0xac   : > { %v2745_v11 = vpack.c.bf16 %v3910_v49, %v3907_v15  ;;  %v2992_v14 = vpop.eup %2991  ;;  %727 = vst [vmem:[%s3650_s8 + $0x1d8] sm:$0xff] %v663_v51  ;;  %v615_v20 = vadd.f32 0.5, %v551_v62  ;;  %v583_v21 = vmul.f32 0.5, %v2990_v5  ;;  %3011 = vtanh.f32 %v474_v10  ;;  %v914_v5 = vld [vmem:[#allocation6 + $0x18] sm:$0xff] }
  0xad   : > { %v426_v23 = vmul.f32 0.5, %v3920_v13  ;;  %v2994_v27 = vpop.eup %2993  ;;  %678 = vst [vmem:[%s3650_s8 + $0x50] sm:$0xff] %v614_v36  ;;  %v646_v60 = vadd.f32 0.5, %v582_v40  ;;  %v568_v55 = vmul.f32 0.5, %v2992_v14  ;;  %3013 = vtanh.f32 %v475_v63  ;;  %v913_v63 = vld [vmem:[#allocation6 + $0x10] sm:$0xff] }
  0xae   : > { %2746 = vmatprep.subr.bf16.mxu1 %v2745_v11  ;;  %v427_v28 = vmul.f32 0.5, %v3923_v46  ;;  %v2996_v34 = vpop.eup %2995  ;;  %679 = vst [vmem:[%s3650_s8 + $0x58] sm:$0xff] %v615_v20  ;;  %v647_v1 = vadd.f32 0.5, %v583_v21  ;;  %v569_v37 = vmul.f32 0.5, %v2994_v27  ;;  %v2715_v19 = vpack.c.bf16 %v3923_v46, %v3920_v13  ;;  %v1379_v27 = vld [vmem:[#allocation8 + $0x18] sm:$0xff] }
  0xaf   : > { %3015 = vtanh.f32 %v426_v23  ;;  %v2998_v18 = vpop.eup %2997  ;;  %710 = vst [vmem:[%s3650_s8 + $0x150] sm:$0xff] %v646_v60  ;;  %v632_v35 = vadd.f32 0.5, %v568_v55  ;;  %v600_v30 = vmul.f32 0.5, %v2996_v34  ;;  %v458_v31 = vmul.f32 0.5, %v3930_v33  ;;  %v1378_v23 = vld [vmem:[#allocation8 + $0x10] sm:$0xff] }
  0xb0   : > { %3017 = vtanh.f32 %v427_v28  ;;  %v3000_v12 = vpop.eup %2999  ;;  %711 = vst [vmem:[%s3650_s8 + $0x158] sm:$0xff] %v647_v1  ;;  %v633_v17 = vadd.f32 0.5, %v569_v37  ;;  %v601_v48 = vmul.f32 0.5, %v2998_v18  ;;  %2716 = vmatpush3.bf16.xpose.msra.mxu0 %v2715_v19  ;;  %v459_v32 = vmul.f32 0.5, %v3933_v0 }
  0xb1   : > { %v2747_v45 = vpack.c.bf16 %v3933_v0, %v3930_v33  ;;  %v3002_v4 = vpop.eup %3001  ;;  %696 = vst [vmem:[%s3650_s8 + $0xe0] sm:$0xff] %v632_v35  ;;  %v664_v9 = vadd.f32 0.5, %v600_v30  ;;  %v552_v22 = vmul.f32 0.5, %v3000_v12  ;;  %3019 = vtanh.f32 %v458_v31 }
  0xb2   : > { %v2749_v47 = vpack.c.bf16 %v912_v29, %v911_v16  ;;  %v3004_v10 = vpop.eup %3003  ;;  %697 = vst [vmem:[%s3650_s8 + $0xe8] sm:$0xff] %v633_v17  ;;  %v665_v58 = vadd.f32 0.5, %v601_v48  ;;  %v553_v51 = vmul.f32 0.5, %v3002_v4  ;;  %3021 = vtanh.f32 %v459_v32  ;;  %v915_v16 = vld [vmem:[#allocation6 + $0x20] sm:$0xff]  ;;  %v916_v29 = vld [vmem:[#allocation6 + $0x28] sm:$0xff] }
  0xb3   : > { %2748 = vmatpush3.bf16.xpose.msra.mxu1 %v2747_v45  ;;  %v2781_v62 = vpack.c.bf16 %v1377_v42, %v1376_v41  ;;  %v3006_v36 = vpop.eup %3005  ;;  %728 = vst [vmem:[%s3650_s8 + $0x1e0] sm:$0xff] %v664_v9  ;;  %v616_v40 = vadd.f32 0.5, %v552_v22  ;;  %v584_v11 = vmul.f32 0.5, %v3004_v10  ;;  %v2753_v34 = vpack.c.bf16 %v914_v5, %v913_v63  ;;  %v1380_v17 = vld [vmem:[#allocation8 + $0x20] sm:$0xff]  ;;  %v1381_v48 = vld [vmem:[#allocation8 + $0x28] sm:$0xff] }
  0xb4   : > { %2750 = vmatprep.subr.bf16.mxu0 %v2749_v47  ;;  %v3008_v14 = vpop.eup %3007  ;;  %729 = vst [vmem:[%s3650_s8 + $0x1e8] sm:$0xff] %v665_v58  ;;  %v617_v20 = vadd.f32 0.5, %v553_v51  ;;  %v585_v21 = vmul.f32 0.5, %v3006_v36  ;;  %v2785_v31 = vpack.c.bf16 %v1379_v27, %v1378_v23  ;;  %v2757_v9 = vpack.c.bf16 %v916_v29, %v915_v16  ;;  %v918_v58 = vld [vmem:[#allocation6 + $0x38] sm:$0xff]  ;;  %v3023_v51 = vld [vmem:[%s3516_s14] sm:$0xff] }
  0xb5   : > { %2782 = vmatprep.subr.bf16.mxu1 %v2781_v62  ;;  %v3010_v60 = vpop.eup %3009  ;;  %680 = vst [vmem:[%s3650_s8 + $0x60] sm:$0xff] %v616_v40  ;;  %v648_v55 = vadd.f32 0.5, %v584_v11  ;;  %v570_v28 = vmul.f32 0.5, %v3008_v14  ;;  %v1312_v63 = vmul.f32 %v3023_v51, %v3023_v51  ;;  %v2789_v36 = vpack.c.bf16 %v1381_v48, %v1380_v17  ;;  %v1382_v14 = vld [vmem:[#allocation8 + $0x30] sm:$0xff]  ;;  %v919_v27 = vld [vmem:[#allocation6 + $0x40] sm:$0xff]  ;;  %v922_v16 = vld [vmem:[#allocation6 + $0x58] sm:$0xff] }
  0xb6   : > { %v3012_v1 = vpop.eup %3011  ;;  %681 = vst [vmem:[%s3650_s8 + $0x68] sm:$0xff] %v617_v20  ;;  %v649_v37 = vadd.f32 0.5, %v585_v21  ;;  %v571_v19 = vmul.f32 0.5, %v3010_v60  ;;  %v1383_v20 = vld [vmem:[#allocation8 + $0x38] sm:$0xff]  ;;  %v920_v60 = vld [vmem:[#allocation6 + $0x48] sm:$0xff] }
  0xb7   : > { %v3014_v18 = vpop.eup %3013  ;;  %712 = vst [vmem:[%s3650_s8 + $0x160] sm:$0xff] %v648_v55  ;;  %v634_v35 = vadd.f32 0.5, %v570_v28  ;;  %v602_v30 = vmul.f32 0.5, %v3012_v1  ;;  %2234 = vmatmul.mubr.f32.vlgmr.msra.gmra.mrb[0].mxu0 %v3688_v53  ;;  %v2793_v28 = vpack.c.bf16 %v1383_v20, %v1382_v14  ;;  %v1385_v1 = vld [vmem:[#allocation8 + $0x48] sm:$0xff]  ;;  %v3029_v20 = vld [vmem:[%s3516_s14 + $0x30] sm:$0xff] }
  0xb8   : > { %713 = vst [vmem:[%s3650_s8 + $0x168] sm:$0xff] %v649_v37  ;;  %v635_v42 = vadd.f32 0.5, %v571_v19  ;;  %v603_v12 = vmul.f32 0.5, %v3014_v18  ;;  %2752 = vmatpush3.bf16.msra.mxu0 %v2749_v47  ;;  %2461 = vmatprep.mubr.f32.mxu0 %v3531_v8  ;;  %v917_v47 = vld [vmem:[#allocation6 + $0x30] sm:$0xff]  ;;  %v2765_v37 = vpack.c.bf16 %v920_v60, %v919_v27  ;;  %v1389_v17 = vld [vmem:[#allocation8 + $0x68] sm:$0xff]  ;;  %v1320_v27 = vmul.f32 %v3715_v54, %v3715_v54 }
  0xb9   : > { %v3016_v41 = vpop.eup %3015  ;;  %698 = vst [vmem:[%s3650_s8 + $0xf0] sm:$0xff] %v634_v35  ;;  %v666_v45 = vadd.f32 0.5, %v602_v30  ;;  %2754 = vmatprep.subr.bf16.mxu0 %v2753_v34  ;;  %v2761_v21 = vpack.c.bf16 %v918_v58, %v917_v47  ;;  %v921_v19 = vld [vmem:[#allocation6 + $0x50] sm:$0xff]  ;;  %v1387_v35 = vld [vmem:[#allocation8 + $0x58] sm:$0xff]  ;;  %v3024_v58 = vld [vmem:[%s3516_s14 + $0x8] sm:$0xff]  ;;  %v1321_v60 = vmul.f32 %v3718_v61, %v3718_v61 }
  0xba   : > { %v3018_v32 = vpop.eup %3017  ;;  %v554_v4 = vmul.f32 0.5, %v3016_v41  ;;  %2268 = vmatmul.mubr.f32.vlgmr.msra.gmra.mrb[0].mxu1 %v3688_v53  ;;  %699 = vst [vmem:[%s3650_s8 + $0xf8] sm:$0xff] %v635_v42  ;;  %v667_v22 = vadd.f32 0.5, %v603_v12  ;;  %v1386_v18 = vld [vmem:[#allocation8 + $0x50] sm:$0xff]  ;;  %v2769_v30 = vpack.c.bf16 %v922_v16, %v921_v19  ;;  %v924_v41 = vld [vmem:[#allocation6 + $0x68] sm:$0xff]  ;;  %v1388_v12 = vld [vmem:[#allocation8 + $0x60] sm:$0xff]  ;;  %v1313_v51 = vmul.f32 %v3024_v58, %v3024_v58 }
  0xbb   : > { %v555_v10 = vmul.f32 0.5, %v3018_v32  ;;  %2784 = vmatpush3.bf16.msra.mxu1 %v2781_v62  ;;  %v3020_v8 = vpop.eup %3019  ;;  %730 = vst [vmem:[%s3650_s8 + $0x1f0] sm:$0xff] %v666_v45  ;;  %2589 = vmatprep.mubr.f32.mxu1 %v1312_v63  ;;  %v2801_v42 = vpack.c.bf16 %v1387_v35, %v1386_v18  ;;  %v925_v32 = vld [vmem:[#allocation6 + $0x70] sm:$0xff]  ;;  %v926_v45 = vld [vmem:[#allocation6 + $0x78] sm:$0xff] }
  0xbc   : > { %v618_v5 = vadd.f32 0.5, %v554_v4  ;;  %2786 = vmatprep.subr.bf16.mxu1 %v2785_v31  ;;  %v3022_v40 = vpop.eup %3021  ;;  %731 = vst [vmem:[%s3650_s8 + $0x1f8] sm:$0xff] %v667_v22  ;;  %v586_v11 = vmul.f32 0.5, %v3020_v8  ;;  %2756 = vmatpush3.bf16.msra.mxu0 %v2753_v34  ;;  %v1384_v34 = vld [vmem:[#allocation8 + $0x40] sm:$0xff]  ;;  %v2805_v4 = vpack.c.bf16 %v1389_v17, %v1388_v12  ;;  %v1391_v22 = vld [vmem:[#allocation8 + $0x78] sm:$0xff]  ;;  %v3025_v63 = vld [vmem:[%s3516_s14 + $0x10] sm:$0xff] }
  0xbd   : > { %v619_v53 = vadd.f32 0.5, %v555_v10  ;;  %v587_v62 = vmul.f32 0.5, %v3022_v40  ;;  %2758 = vmatprep.subr.bf16.mxu0 %v2757_v9  ;;  %v2797_v29 = vpack.c.bf16 %v1385_v1, %v1384_v34  ;;  %v2777_v10 = vpack.c.bf16 %v926_v45, %v925_v32  ;;  %v3027_v40 = vld [vmem:[%s3516_s14 + $0x20] sm:$0xff]  ;;  %v3032_v1 = vld [vmem:[%s3516_s14 + $0x88] sm:$0xff]  ;;  %v3034_v19 = vld [vmem:[%s3516_s14 + $0x98] sm:$0xff] }
  0xbe   : > { %682 = vst [vmem:[%s3650_s8 + $0x70] sm:$0xff] %v618_v5  ;;  %v650_v23 = vadd.f32 0.5, %v586_v11  ;;  %v1314_v8 = vmul.f32 %v3025_v63, %v3025_v63  ;;  %v3026_v5 = vld [vmem:[%s3516_s14 + $0x18] sm:$0xff]  ;;  %v3028_v11 = vld [vmem:[%s3516_s14 + $0x28] sm:$0xff]  ;;  %v1331_v16 = vmul.f32 %v3034_v19, %v3034_v19  ;;  %v3039_v12 = vld [vmem:[%s3516_s14 + $0xc0] sm:$0xff]  ;;  %v1338_v45 = vmul.f32 %v3765_v3, %v3765_v3 }
  0xbf   : > { %683 = vst [vmem:[%s3650_s8 + $0x78] sm:$0xff] %v619_v53  ;;  %2788 = vmatpush3.bf16.msra.mxu1 %v2785_v31  ;;  %v651_v55 = vadd.f32 0.5, %v587_v62  ;;  %v923_v31 = vld [vmem:[#allocation6 + $0x60] sm:$0xff]  ;;  %v1316_v53 = vmul.f32 %v3027_v40, %v3027_v40  ;;  %v1317_v14 = vmul.f32 %v3028_v11, %v3028_v11  ;;  %v1318_v62 = vmul.f32 %v3029_v20, %v3029_v20 }
  0xc0   : > { %2790 = vmatprep.subr.bf16.mxu1 %v2789_v36  ;;  %714 = vst [vmem:[%s3650_s8 + $0x170] sm:$0xff] %v650_v23  ;;  %2760 = vmatpush3.bf16.msra.mxu0 %v2757_v9  ;;  %v2773_v48 = vpack.c.bf16 %v924_v41, %v923_v31  ;;  %v1390_v9 = vld [vmem:[#allocation8 + $0x70] sm:$0xff]  ;;  %v3038_v41 = vld [vmem:[%s3516_s14 + $0xb8] sm:$0xff]  ;;  %v1336_v17 = vmul.f32 %v3039_v12, %v3039_v12 }
  0xc1   : > { %715 = vst [vmem:[%s3650_s8 + $0x178] sm:$0xff] %v651_v55  ;;  %2762 = vmatprep.subr.bf16.mxu0 %v2761_v21  ;;  %v2809_v47 = vpack.c.bf16 %v1391_v22, %v1390_v9  ;;  %v1322_v55 = vmul.f32 %v3797_v26, %v3797_v26  ;;  %v1340_v9 = vmul.f32 %v3836_v38, %v3836_v38 }
  0xc2   : > { %v1341_v22 = vmul.f32 %v3839_v2, %v3839_v2 }
  0xc3   : > { %2792 = vmatpush3.bf16.msra.mxu1 %v2789_v36  ;;  %v1315_v36 = vmul.f32 %v3026_v5, %v3026_v5 }
  0xc4   : > { %2794 = vmatprep.subr.bf16.mxu1 %v2793_v28  ;;  %2764 = vmatpush3.bf16.msra.mxu0 %v2761_v21  ;;  %v3030_v21 = vld [vmem:[%s3516_s14 + $0x38] sm:$0xff] }
  0xc5   : > { %2766 = vmatprep.subr.bf16.mxu0 %v2765_v37  ;;  %v1319_v23 = vmul.f32 %v3030_v21, %v3030_v21 }
  0xc7   : > { %2796 = vmatpush3.bf16.msra.mxu1 %v2793_v28  ;;  %v1323_v28 = vmul.f32 %v3800_v57, %v3800_v57 }
  0xc8   : > { %2798 = vmatprep.subr.bf16.mxu1 %v2797_v29  ;;  %2768 = vmatpush3.bf16.msra.mxu0 %v2765_v37  ;;  %v1329_v37 = vmul.f32 %v3032_v1, %v3032_v1 }
  0xc9   : > { %2770 = vmatprep.subr.bf16.mxu0 %v2769_v30 }
  0xcb   : > { %2800 = vmatpush3.bf16.msra.mxu1 %v2797_v29  ;;  %v3035_v29 = vld [vmem:[%s3516_s14 + $0xa0] sm:$0xff] }
  0xcc   : > { %2802 = vmatprep.subr.bf16.mxu1 %v2801_v42  ;;  %2772 = vmatpush3.bf16.msra.mxu0 %v2769_v30  ;;  %v1332_v18 = vmul.f32 %v3035_v29, %v3035_v29  ;;  %v3037_v30 = vld [vmem:[%s3516_s14 + $0xb0] sm:$0xff] }
  0xcd   : > { %2774 = vmatprep.subr.bf16.mxu0 %v2773_v48  ;;  %v1334_v31 = vmul.f32 %v3037_v30, %v3037_v30 }
  0xcf   : > { %2804 = vmatpush3.bf16.msra.mxu1 %v2801_v42  ;;  %v1335_v42 = vmul.f32 %v3038_v41, %v3038_v41 }
  0xd0   : > { %2806 = vmatprep.subr.bf16.mxu1 %v2805_v4  ;;  %2776 = vmatpush3.bf16.msra.mxu0 %v2773_v48  ;;  %v3040_v48 = vld [vmem:[%s3516_s14 + $0xc8] sm:$0xff] }
  0xd1   : > { %2778 = vmatprep.subr.bf16.mxu0 %v2777_v10  ;;  %v1337_v32 = vmul.f32 %v3040_v48, %v3040_v48 }
  0xd3   : > { %2808 = vmatpush3.bf16.msra.mxu1 %v2805_v4  ;;  %v1339_v4 = vmul.f32 %v3768_v6, %v3768_v6 }
  0xd4   : > { %2810 = vmatprep.subr.bf16.mxu1 %v2809_v47  ;;  %2780 = vmatpush3.bf16.msra.mxu0 %v2777_v10 }
  0xd7   : > { %2812 = vmatpush3.bf16.msra.mxu1 %v2809_v47  ;;  %2462 = vmatmul.mubr.f32.vlgmr.msra.gmra.mrb[2].mxu0 %v3024_v58  ;;  %v3042_v47 = vld [vmem:[%s3516_s14 + $0x108] sm:$0xff] }
  0xd8   : > { %2464 = vmatprep.mubr.f32.mxu0 %v3025_v63  ;;  %v1345_v58 = vmul.f32 %v3042_v47, %v3042_v47 }
  0xda   : > { %2590 = vmatmul.mubr.f32.vlgmr.msra.gmra.mrb[2].mxu1 %v1313_v51  ;;  %v3044_v51 = vld [vmem:[%s3516_s14 + $0x118] sm:$0xff] }
  0xdb   : > { %2592 = vmatprep.mubr.f32.mxu1 %v1314_v8  ;;  %2465 = vmatmul.mubr.f32.gmra.mrb[4].mxu0 %v3026_v5  ;;  %v1347_v63 = vmul.f32 %v3044_v51, %v3044_v51  ;;  %v3045_v8 = vld [vmem:[%s3516_s14 + $0x120] sm:$0xff] }
  0xdc   : > { %2467 = vmatprep.mubr.f32.mxu0 %v3027_v40  ;;  %v1348_v5 = vmul.f32 %v3045_v8, %v3045_v8  ;;  %v3047_v40 = vld [vmem:[%s3516_s14 + $0x130] sm:$0xff] }
  0xde   : > { %2593 = vmatmul.mubr.f32.gmra.mrb[4].mxu1 %v1315_v36 }
  0xdf   : > { %2595 = vmatprep.mubr.f32.mxu1 %v1316_v53  ;;  %2468 = vmatmul.mubr.f32.gmra.mrb[6].mxu0 %v3028_v11  ;;  %v1350_v53 = vmul.f32 %v3047_v40, %v3047_v40  ;;  %v3048_v11 = vld [vmem:[%s3516_s14 + $0x138] sm:$0xff] }
  0xe0   : > { %2470 = vmatprep.mubr.f32.mxu0 %v3029_v20  ;;  %v3049_v20 = vld [vmem:[%s3516_s14 + $0x140] sm:$0xff] }
  0xe2   : > { %2596 = vmatmul.mubr.f32.gmra.mrb[6].mxu1 %v1317_v14  ;;  %v1351_v14 = vmul.f32 %v3048_v11, %v3048_v11 }
  0xe3   : > { %2598 = vmatprep.mubr.f32.mxu1 %v1318_v62  ;;  %2471 = vmatmul.mubr.f32.gmra.mrb[8].mxu0 %v3030_v21  ;;  %v1352_v62 = vmul.f32 %v3049_v20, %v3049_v20  ;;  %v3050_v21 = vld [vmem:[%s3516_s14 + $0x148] sm:$0xff] }
  0xe4   : > { %2473 = vmatprep.mubr.f32.mxu0 %v3715_v54  ;;  %v1324_v54 = vmul.f32 %v3868_v52, %v3868_v52 }
  0xe6   : > { %2599 = vmatmul.mubr.f32.gmra.mrb[8].mxu1 %v1319_v23  ;;  %v1353_v23 = vmul.f32 %v3050_v21, %v3050_v21 }
  0xe7   : > { %2601 = vmatprep.mubr.f32.mxu1 %v1320_v27  ;;  %2474 = vmatmul.mubr.f32.gmra.mrb[10].mxu0 %v3718_v61  ;;  %v1325_v61 = vmul.f32 %v3871_v56, %v3871_v56  ;;  %v1354_v27 = vmul.f32 %v3820_v59, %v3820_v59 }
  0xe8   : > { %2476 = vmatprep.mubr.f32.mxu0 %v3797_v26  ;;  %v1326_v26 = vmul.f32 %v3920_v13, %v3920_v13 }
  0xea   : > { %2602 = vmatmul.mubr.f32.gmra.mrb[10].mxu1 %v1321_v60  ;;  %v1355_v60 = vmul.f32 %v3823_v50, %v3823_v50 }
  0xeb   : > { %2604 = vmatprep.mubr.f32.mxu1 %v1322_v55  ;;  %2477 = vmatmul.mubr.f32.gmra.mrb[12].mxu0 %v3800_v57  ;;  %v1327_v57 = vmul.f32 %v3923_v46, %v3923_v46  ;;  %v1356_v55 = vmul.f32 %v3881_v24, %v3881_v24 }
  0xec   : > { %2479 = vmatprep.mubr.f32.mxu0 %v3868_v52  ;;  %v3031_v52 = vld [vmem:[%s3516_s14 + $0x80] sm:$0xff] }
  0xed   : > { %v1328_v34 = vmul.f32 %v3031_v52, %v3031_v52 }
  0xee   : > { %2605 = vmatmul.mubr.f32.gmra.mrb[12].mxu1 %v1323_v28  ;;  %v1357_v28 = vmul.f32 %v3884_v25, %v3884_v25 }
  0xef   : > { %2607 = vmatprep.mubr.f32.mxu1 %v1324_v54  ;;  %2480 = vmatmul.mubr.f32.gmra.mrb[14].mxu0 %v3871_v56  ;;  %v3033_v56 = vld [vmem:[%s3516_s14 + $0x90] sm:$0xff] }
  0xf0   : > { %2482 = vmatprep.mubr.f32.mxu0 %v3920_v13  ;;  %v1330_v13 = vmul.f32 %v3033_v56, %v3033_v56 }
  0xf2   : > { %2608 = vmatmul.mubr.f32.gmra.mrb[14].mxu1 %v1325_v61  ;;  %v3052_v61 = vld [vmem:[%s3516_s14 + $0x188] sm:$0xff] }
  0xf3   : > { %2610 = vmatprep.mubr.f32.mxu1 %v1326_v26  ;;  %2483 = vmatmul.mubr.f32.gmra.mrb[16].mxu0 %v3923_v46  ;;  %v3036_v46 = vld [vmem:[%s3516_s14 + $0xa8] sm:$0xff]  ;;  %v1361_v26 = vmul.f32 %v3052_v61, %v3052_v61 }
  0xf4   : > { %2485 = vmatprep.mubr.f32.mxu0 %v3031_v52  ;;  %v1333_v35 = vmul.f32 %v3036_v46, %v3036_v46 }
  0xf6   : > { %2611 = vmatmul.mubr.f32.gmra.mrb[16].mxu1 %v1327_v57  ;;  %v3054_v57 = vld [vmem:[%s3516_s14 + $0x198] sm:$0xff] }
  0xf7   : > { %2613 = vmatprep.mubr.f32.mxu1 %v1328_v34  ;;  %2486 = vmatmul.mubr.f32.gmra.mrb[18].mxu0 %v3032_v1  ;;  %v1363_v52 = vmul.f32 %v3054_v57, %v3054_v57  ;;  %v3055_v34 = vld [vmem:[%s3516_s14 + $0x1a0] sm:$0xff] }
  0xf8   : > { %2488 = vmatprep.mubr.f32.mxu0 %v3033_v56  ;;  %v1364_v1 = vmul.f32 %v3055_v34, %v3055_v34  ;;  %v3057_v56 = vld [vmem:[%s3516_s14 + $0x1b0] sm:$0xff] }
  0xfa   : > { %2614 = vmatmul.mubr.f32.gmra.mrb[18].mxu1 %v1329_v37 }
  0xfb   : > { %2616 = vmatprep.mubr.f32.mxu1 %v1330_v13  ;;  %2489 = vmatmul.mubr.f32.gmra.mrb[20].mxu0 %v3034_v19  ;;  %v1366_v13 = vmul.f32 %v3057_v56, %v3057_v56  ;;  %v3058_v19 = vld [vmem:[%s3516_s14 + $0x1b8] sm:$0xff] }
  0xfc   : > { %2491 = vmatprep.mubr.f32.mxu0 %v3035_v29  ;;  %v3059_v29 = vld [vmem:[%s3516_s14 + $0x1c0] sm:$0xff] }
  0xfe   : > { %2617 = vmatmul.mubr.f32.gmra.mrb[20].mxu1 %v1331_v16  ;;  %v1367_v16 = vmul.f32 %v3058_v19, %v3058_v19 }
  0xff   : > { %2619 = vmatprep.mubr.f32.mxu1 %v1332_v18  ;;  %2492 = vmatmul.mubr.f32.gmra.mrb[22].mxu0 %v3036_v46  ;;  %v1368_v18 = vmul.f32 %v3059_v29, %v3059_v29  ;;  %v3060_v46 = vld [vmem:[%s3516_s14 + $0x1c8] sm:$0xff] }
 0x100   : > { %2494 = vmatprep.mubr.f32.mxu0 %v3037_v30  ;;  %v3061_v30 = vld [vmem:[%s3516_s14 + $0x1d0] sm:$0xff] }
 0x102   : > { %2620 = vmatmul.mubr.f32.gmra.mrb[22].mxu1 %v1333_v35  ;;  %v1369_v35 = vmul.f32 %v3060_v46, %v3060_v46 }
 0x103   : > { %2622 = vmatprep.mubr.f32.mxu1 %v1334_v31  ;;  %2495 = vmatmul.mubr.f32.gmra.mrb[24].mxu0 %v3038_v41  ;;  %v1370_v31 = vmul.f32 %v3061_v30, %v3061_v30  ;;  %v3062_v41 = vld [vmem:[%s3516_s14 + $0x1d8] sm:$0xff] }
 0x104   : > { %2497 = vmatprep.mubr.f32.mxu0 %v3039_v12  ;;  %v1372_v12 = vmul.f32 %v3852_v43, %v3852_v43 }
 0x106   : > { %2623 = vmatmul.mubr.f32.gmra.mrb[24].mxu1 %v1335_v42  ;;  %v1371_v42 = vmul.f32 %v3062_v41, %v3062_v41 }
 0x107   : > { %2625 = vmatprep.mubr.f32.mxu1 %v1336_v17  ;;  %2498 = vmatmul.mubr.f32.gmra.mrb[26].mxu0 %v3040_v48  ;;  %v1373_v17 = vmul.f32 %v3855_v44, %v3855_v44  ;;  %v1374_v48 = vmul.f32 %v3907_v15, %v3907_v15 }
 0x108   : > { %2500 = vmatprep.mubr.f32.mxu0 %v3765_v3  ;;  %v1342_v3 = vmul.f32 %v3894_v39, %v3894_v39 }
 0x10a   : > { %2626 = vmatmul.mubr.f32.gmra.mrb[26].mxu1 %v1337_v32  ;;  %v1375_v32 = vmul.f32 %v3910_v49, %v3910_v49 }
 0x10b   : > { %2628 = vmatprep.mubr.f32.mxu1 %v1338_v45  ;;  %2501 = vmatmul.mubr.f32.gmra.mrb[28].mxu0 %v3768_v6  ;;  %v1343_v6 = vmul.f32 %v3897_v7, %v3897_v7 }
 0x10c   : > { %2503 = vmatprep.mubr.f32.mxu0 %v3836_v38  ;;  %v3041_v38 = vld [vmem:[%s3516_s14 + $0x100] sm:$0xff] }
 0x10d   : > { %v1344_v10 = vmul.f32 %v3041_v38, %v3041_v38 }
 0x10e   : > { %2629 = vmatmul.mubr.f32.gmra.mrb[28].mxu1 %v1339_v4  ;;  %v886_v4 = vlaneseq }
 0x10f   : > { %2631 = vmatprep.mubr.f32.mxu1 %v1340_v9  ;;  %2504 = vmatmul.mubr.f32.gmra.mrb[30].mxu0 %v3839_v2  ;;  %v3043_v2 = vld [vmem:[%s3516_s14 + $0x110] sm:$0xff]  ;;  %v734_v9 = vstv %s733_s25  ;;  %s3153_s25 = sshll.u32 %s3287_s24, 4  ;;  %s3154_s25 = int_to_ptr.vmem [resolvable:$false] %s3153_s25 }
 0x110   : > { %2506 = vmatprep.mubr.f32.mxu0 %v3894_v39  ;;  %v1346_v39 = vmul.f32 %v3043_v2, %v3043_v2  ;;  %vm908_vm0 = vcmp.lt.s32.totalorder %v886_v4, 512  ;;  %s3155_s12 = scalar_lea.vmem %s3154_s25, 128  ;;  %p3156_p11 = scmp.lt.s32.totalorder %s4083_s21, %s3154_s25 }
 0x111   : > { %p3157_p13 = scmp.lt.s32.totalorder %s3155_s12, %s3149_s10 }
 0x112   : > { %2632 = vmatmul.mubr.f32.gmra.mrb[30].mxu1 %v1341_v22 }
 0x113   : > { %2634 = vmatprep.mubr.f32.mxu1 %v1342_v3  ;;  %2507 = vmatmul.mubr.f32.gmra.mrb[32].mxu0 %v3897_v7  ;;  %v3046_v7 = vld [vmem:[%s3516_s14 + $0x128] sm:$0xff]  ;;  %v887_v3 = vshrl.u32 %v886_v4, 7  ;;  %p3158_p3 = por %p3157_p13, %p3156_p11 }
 0x114   : > { %2509 = vmatprep.mubr.f32.mxu0 %v3041_v38  ;;  %v1349_v36 = vmul.f32 %v3046_v7, %v3046_v7 }
 0x115   : > { %p3159_p7 = pnand %p3158_p3, %p3152_p8 }
 0x116   : > { %2635 = vmatmul.mubr.f32.gmra.mrb[32].mxu1 %v1343_v6 }
 0x117   : > { %2637 = vmatprep.mubr.f32.mxu1 %v1344_v10  ;;  %2510 = vmatmul.mubr.f32.gmra.mrb[34].mxu0 %v3042_v47 }
 0x118   : > { %2512 = vmatprep.mubr.f32.mxu0 %v3043_v2 }
 0x11a   : > { %2638 = vmatmul.mubr.f32.gmra.mrb[34].mxu1 %v1345_v58 }
 0x11b   : > { %2640 = vmatprep.mubr.f32.mxu1 %v1346_v39  ;;  %2513 = vmatmul.mubr.f32.gmra.mrb[36].mxu0 %v3044_v51 }
 0x11c   : > { %2515 = vmatprep.mubr.f32.mxu0 %v3045_v8 }
 0x11e   : > { %2641 = vmatmul.mubr.f32.gmra.mrb[36].mxu1 %v1347_v63 }
 0x11f   : > { %2643 = vmatprep.mubr.f32.mxu1 %v1348_v5  ;;  %2516 = vmatmul.mubr.f32.gmra.mrb[38].mxu0 %v3046_v7 }
 0x120   : > { %2518 = vmatprep.mubr.f32.mxu0 %v3047_v40 }
 0x122   : > { %2644 = vmatmul.mubr.f32.gmra.mrb[38].mxu1 %v1349_v36 }
 0x123   : > { %2646 = vmatprep.mubr.f32.mxu1 %v1350_v53  ;;  %2519 = vmatmul.mubr.f32.gmra.mrb[40].mxu0 %v3048_v11 }
 0x124   : > { %2521 = vmatprep.mubr.f32.mxu0 %v3049_v20 }
 0x126   : > { %2647 = vmatmul.mubr.f32.gmra.mrb[40].mxu1 %v1351_v14 }
 0x127   : > { %2649 = vmatprep.mubr.f32.mxu1 %v1352_v62  ;;  %2522 = vmatmul.mubr.f32.gmra.mrb[42].mxu0 %v3050_v21 }
 0x128   : > { %2524 = vmatprep.mubr.f32.mxu0 %v3820_v59  ;;  %v1358_v59 = vmul.f32 %v3930_v33, %v3930_v33 }
 0x12a   : > { %2650 = vmatmul.mubr.f32.gmra.mrb[42].mxu1 %v1353_v23 }
 0x12b   : > { %2652 = vmatprep.mubr.f32.mxu1 %v1354_v27  ;;  %2525 = vmatmul.mubr.f32.gmra.mrb[44].mxu0 %v3823_v50  ;;  %v1359_v50 = vmul.f32 %v3933_v0, %v3933_v0 }
 0x12c   : > { %2527 = vmatprep.mubr.f32.mxu0 %v3881_v24  ;;  %v3051_v24 = vld [vmem:[%s3516_s14 + $0x180] sm:$0xff] }
 0x12d   : > { %v1360_v54 = vmul.f32 %v3051_v24, %v3051_v24 }
 0x12e   : > { %2653 = vmatmul.mubr.f32.gmra.mrb[44].mxu1 %v1355_v60 }
 0x12f   : > { %2655 = vmatprep.mubr.f32.mxu1 %v1356_v55  ;;  %2528 = vmatmul.mubr.f32.gmra.mrb[46].mxu0 %v3884_v25  ;;  %v3053_v25 = vld [vmem:[%s3516_s14 + $0x190] sm:$0xff] }
 0x130   : > { %2530 = vmatprep.mubr.f32.mxu0 %v3930_v33  ;;  %v1362_v33 = vmul.f32 %v3053_v25, %v3053_v25 }
 0x132   : > { %2656 = vmatmul.mubr.f32.gmra.mrb[46].mxu1 %v1357_v28 }
 0x133   : > { %2658 = vmatprep.mubr.f32.mxu1 %v1358_v59  ;;  %2531 = vmatmul.mubr.f32.gmra.mrb[48].mxu0 %v3933_v0  ;;  %v3056_v0 = vld [vmem:[%s3516_s14 + $0x1a8] sm:$0xff]  ;;  %s4086_s14 = scalar_lea.sflag [#allocation11], %s1974_s16 }
 0x134   : > { %2533 = vmatprep.mubr.f32.mxu0 %v3051_v24  ;;  %v1365_v37 = vmul.f32 %v3056_v0, %v3056_v0 }
 0x136   : > { %2659 = vmatmul.mubr.f32.gmra.mrb[48].mxu1 %v1359_v50 }
 0x137   : > { %2661 = vmatprep.mubr.f32.mxu1 %v1360_v54  ;;  %2534 = vmatmul.mubr.f32.gmra.mrb[50].mxu0 %v3052_v61 }
 0x138   : > { %2536 = vmatprep.mubr.f32.mxu0 %v3053_v25 }
 0x13a   : > { %2662 = vmatmul.mubr.f32.gmra.mrb[50].mxu1 %v1361_v26 }
 0x13b   : > { %2664 = vmatprep.mubr.f32.mxu1 %v1362_v33  ;;  %2537 = vmatmul.mubr.f32.gmra.mrb[52].mxu0 %v3054_v57 }
 0x13c   : > { %2539 = vmatprep.mubr.f32.mxu0 %v3055_v34 }
 0x13e   : > { %2665 = vmatmul.mubr.f32.gmra.mrb[52].mxu1 %v1363_v52 }
 0x13f   : > { %2667 = vmatprep.mubr.f32.mxu1 %v1364_v1  ;;  %2540 = vmatmul.mubr.f32.gmra.mrb[54].mxu0 %v3056_v0 }
 0x140   : > { %2542 = vmatprep.mubr.f32.mxu0 %v3057_v56 }
 0x142   : > { %2668 = vmatmul.mubr.f32.gmra.mrb[54].mxu1 %v1365_v37 }
 0x143   : > { %2670 = vmatprep.mubr.f32.mxu1 %v1366_v13  ;;  %2543 = vmatmul.mubr.f32.gmra.mrb[56].mxu0 %v3058_v19 }
 0x144   : > { %2545 = vmatprep.mubr.f32.mxu0 %v3059_v29 }
 0x146   : > { %2671 = vmatmul.mubr.f32.gmra.mrb[56].mxu1 %v1367_v16 }
 0x147   : > { %2673 = vmatprep.mubr.f32.mxu1 %v1368_v18  ;;  %2546 = vmatmul.mubr.f32.gmra.mrb[58].mxu0 %v3060_v46 }
 0x148   : > { %2548 = vmatprep.mubr.f32.mxu0 %v3061_v30 }
 0x14a   : > { %2674 = vmatmul.mubr.f32.gmra.mrb[58].mxu1 %v1369_v35 }
 0x14b   : > { %2676 = vmatprep.mubr.f32.mxu1 %v1370_v31  ;;  %2549 = vmatmul.mubr.f32.gmra.mrb[60].mxu0 %v3062_v41 }
 0x14c   : > { %2551 = vmatprep.mubr.f32.mxu0 %v3852_v43  ;;  %v3286_v43 = vmov 1966171168  }
 0x14d   : > { %v884_v45 = vunpack.c.l.s4 %v3286_v43 }
 0x14e   : > { %2677 = vmatmul.mubr.f32.gmra.mrb[60].mxu1 %v1371_v42 }
 0x14f   : > { %2679 = vmatprep.mubr.f32.mxu1 %v1372_v12  ;;  %2552 = vmatmul.mubr.f32.gmra.mrb[62].mxu0 %v3855_v44  ;;  %v885_v22 = vunpack.c.0.s8 %v884_v45 }
 0x150   : > { %2554 = vmatprep.mubr.f32.mxu0 %v3907_v15 }
 0x151   : > { %v888_v47 = vsub.s32 %v885_v22, %v887_v3 }
 0x152   : > { %2680 = vmatmul.mubr.f32.gmra.mrb[62].mxu1 %v1373_v17 }
 0x153   : > { %2682 = vmatprep.mubr.f32.mxu1 %v1374_v48  ;;  %2555 = vmatmul.mubr.f32.gmra.mrb[64].mxu0 %v3910_v49 }
 0x156   : > { %2683 = vmatmul.mubr.f32.gmra.mrb[64].mxu1 %v1375_v32 }
 0x18a   : > { %v801_v6 = vpop.f32.mrb[0].mxu0 }
 0x18b   : > { %v802_v44 = vadd.f32 %v801_v6, %v734_v9  ;;  %v803_v38 = vpop.f32.mrb[1].mxu0 }
 0x18c   : > { %v804_v10 = vadd.f32 %v803_v38, %v734_v9 }
 0x18d   : > { %v872_v15 = vpop.f32.mrb[0].mxu1 }
 0x18e   : > { %v873_v58 = vadd.f32 %v872_v15, %v734_v9  ;;  %v874_v2 = vpop.f32.mrb[1].mxu1  ;;  %v881_v39 = vcombine.low %v802_v44, %v804_v10 }
 0x18f   : > { %v875_v51 = vadd.f32 %v874_v2, %v734_v9 }
 0x190   : > { %v889_v49 = vrot.slane %v881_v39, %v888_v47 }
 0x191   : > { %v882_v63 = vcombine.low %v873_v58, %v875_v51 }
 0x193   : > { %v896_v8 = vrot.slane %v882_v63, %v888_v47 }
 0x195   : > { %v897_v5 = vcombine.low %v889_v49, %v896_v8 }
 0x197   : > { %v904_v7 = vrot.slane %v897_v5, %v888_v47 }
 0x199   : > { %910 = vst.msk [vmem:[%s337_s11] sm:$0xf] %vm908_vm0, %v904_v7 }
 0x1aa   : > { %v2463_v36 = vpop.f32.mrb[2].mxu0 }
 0x1ab   : > { %v1778_v40 = vmul.f32 %v2463_v36, %v2463_v36  ;;  %v993_v53 = vpop.f32.mrb[3].mxu0 }
 0x1ac   : > { %v1777_v11 = vmul.f32 %v993_v53, %v993_v53 }
 0x1ad   : > { %v2591_v14 = vpop.f32.mrb[2].mxu1 }
 0x1ae   : > { %v1842_v20 = vsub.f32 %v1778_v40, %v2591_v14  ;;  %v1458_v62 = vpop.f32.mrb[3].mxu1  ;;  %v2466_v23 = vpop.f32.mrb[4].mxu0 }
 0x1af   : > { %v1841_v21 = vsub.f32 %v1777_v11, %v1458_v62  ;;  %v1780_v27 = vmul.f32 %v2466_v23, %v2466_v23  ;;  %v1003_v60 = vpop.f32.mrb[5].mxu0 }
 0x1b0   : > { %v1779_v28 = vmul.f32 %v1003_v60, %v1003_v60 }
 0x1b1   : > { %v1905_v55 = vadd.f32 %v1842_v20, %v1841_v21  ;;  %v2594_v59 = vpop.f32.mrb[4].mxu1 }
 0x1b2   : > { %v1844_v50 = vsub.f32 %v1780_v27, %v2594_v59  ;;  %v1468_v24 = vpop.f32.mrb[5].mxu1  ;;  %v2469_v61 = vpop.f32.mrb[6].mxu0 }
 0x1b3   : > { %v1843_v54 = vsub.f32 %v1779_v28, %v1468_v24 }
 0x1b4   : > { %3162 = shalt.err (!%p3159_p7)
}
 0x1b5   : > { %s3163_s11 = scalar_lea.hbm %s4081_s22, 64  ;;  %s3167_s20 = scalar_lea.hbm %s4194_s6, 192 }
 0x1b6   : > { %p3164_p9 = scmp.ne.s32.totalorder %s4081_s22, %s3163_s11  ;;  %p3168_p5 = scmp.lt.u32.totalorder %s4081_s22, %s4194_s6 }
 0x1b7   : > { %p3169_p10 = scmp.lt.u32.totalorder %s3167_s20, %s3163_s11  ;;  %p3171_p2 = scmp.lt.u32.totalorder %s3163_s11, %s4081_s22 }
 0x1b8   : > { %p3165_p12 = pnand %p3164_p9, %p3455_p6 }
 0x1b9   : > { %p3170_p1 = por %p3169_p10, %p3168_p5 }
 0x1ba   : > { %p3166_p0 = pneg %p3165_p12 }
 0x1bb   : > { %p3172_p4 = por %p3171_p2, %p3170_p1 }
 0x1bd   : > { %p3173_p8 = pnand %p3172_p4, %p3166_p0 }
 0x1bf   : > { %3176 = shalt.err (!%p3173_p8)
}
 0x1c0   : > { %2824 = dma.vmem_to_hbm [thread:$0]  (%p3455_p6), %s4083_s21, 64, %s4081_s22, %s4086_s14   ;;  %v1782_v26 = vmul.f32 %v2469_v61, %v2469_v61  ;;  %v1013_v25 = vpop.f32.mrb[7].mxu0  ;;  %v1906_v33 = vadd.f32 %v1905_v55, %v1843_v54  ;;  %v2597_v52 = vpop.f32.mrb[6].mxu1 }
 0x1c1   : > { %s4115_s12 = scalar_lea.hbm %s4193_s5, %s2199_s23  ;;  %s1993_s11 = sshll.u32 %s3650_s8, 4  ;;  %v1781_v57 = vmul.f32 %v1013_v25, %v1013_v25  ;;  %v1478_v1 = vpop.f32.mrb[7].mxu1  ;;  %v2472_v56 = vpop.f32.mrb[8].mxu0  ;;  %s4118_s11 = int_to_ptr.vmem [resolvable:$true] %s1993_s11 }
 0x1c2   : > { %v1846_v34 = vsub.f32 %v1782_v26, %v2597_v52  ;;  %v1907_v0 = vadd.f32 %v1906_v33, %v1844_v50  ;;  %s1970_s22 = scalar_lea.sflag [#allocation5], %s3510_s30  ;;  %s3177_s21 = scalar_lea.vmem %s4118_s11, 8192 }
 0x1c3   : > { %v1845_v37 = vsub.f32 %v1781_v57, %v1478_v1  ;;  %p3178_p11 = scmp.ne.s32.totalorder %s4118_s11, %s3177_s21  ;;  %s3288_s8 = smov [#allocation9]  }
 0x1c4   : > { %s3181_s23 = sshll.u32 %s3288_s8, 4  ;;  %s3182_s23 = int_to_ptr.vmem [resolvable:$false] %s3181_s23 }
 0x1c5   : > { %p3179_p13 = pnand %p3178_p11, %p3455_p6  ;;  %s3183_s16 = scalar_lea.vmem %s3182_s23, 16384 }
 0x1c6   : > { %p3184_p7 = scmp.lt.s32.totalorder %s4118_s11, %s3182_s23  ;;  %p3185_p9 = scmp.lt.s32.totalorder %s3183_s16, %s3177_s21 }
 0x1c7   : > { %p3180_p3 = pneg %p3179_p13 }
 0x1c8   : > { %p3186_p12 = por %p3185_p9, %p3184_p7 }
 0x1ca   : > { %p3187_p0 = pnand %p3186_p12, %p3180_p3 }
 0x1cc   : > { %3190 = shalt.err (!%p3187_p0)
}
 0x1cd   : > { %s3191_s19 = scalar_lea.hbm %s4115_s12, 8192  ;;  %s3195_s24 = scalar_lea.hbm %s4193_s5, 24576 }
 0x1ce   : > { %p3192_p5 = scmp.ne.s32.totalorder %s4115_s12, %s3191_s19  ;;  %p3196_p2 = scmp.lt.u32.totalorder %s4115_s12, %s4193_s5 }
 0x1cf   : > { %p3197_p4 = scmp.lt.u32.totalorder %s3195_s24, %s3191_s19  ;;  %p3199_p11 = scmp.lt.u32.totalorder %s3191_s19, %s4115_s12 }
 0x1d0   : > { %p3193_p10 = pnand %p3192_p5, %p3455_p6 }
 0x1d1   : > { %p3198_p8 = por %p3197_p4, %p3196_p2 }
 0x1d2   : > { %p3194_p1 = pneg %p3193_p10 }
 0x1d3   : > { %p3200_p13 = por %p3199_p11, %p3198_p8 }
 0x1d5   : > { %p3201_p3 = pnand %p3200_p13, %p3194_p1 }
 0x1d7   : > { %3204 = shalt.err (!%p3201_p3)
}
 0x1d8   : > { %s3289_s21 = smov 128   ;;  %s3290_s8 = smov 8   ;;  %v1784_v13 = vmul.f32 %v2472_v56, %v2472_v56  ;;  %v1023_v19 = vpop.f32.mrb[9].mxu0  ;;  %v1908_v16 = vadd.f32 %v1907_v0, %v1845_v37  ;;  %v2600_v18 = vpop.f32.mrb[8].mxu1 }
 0x1d9   : > { %2823 = dma.vmem_to_hbm [thread:$0]  (%p3455_p6), %s4118_s11, 8192, %s4115_s12, %s1970_s22, %s3289_s21, %s3289_s21, %s3290_s8   ;;  %v1783_v29 = vmul.f32 %v1023_v19, %v1023_v19  ;;  %v1488_v35 = vpop.f32.mrb[9].mxu1  ;;  %v2475_v41 = vpop.f32.mrb[10].mxu0 }
 0x1da   : > { %v1848_v46 = vsub.f32 %v1784_v13, %v2600_v18  ;;  %v1909_v31 = vadd.f32 %v1908_v16, %v1846_v34  ;;  %v1786_v42 = vmul.f32 %v2475_v41, %v2475_v41  ;;  %v1033_v12 = vpop.f32.mrb[11].mxu0  ;;  %v2603_v32 = vpop.f32.mrb[10].mxu1  ;;  %s2187_s12 = sshll.u32 %s3510_s30, 3  ;;  %s2195_s11 = sshll.u32 %s3356_s2, 7 }
 0x1db   : > { %v1847_v30 = vsub.f32 %v1783_v29, %v1488_v35  ;;  %v1785_v48 = vmul.f32 %v1033_v12, %v1033_v12  ;;  %v1498_v45 = vpop.f32.mrb[11].mxu1  ;;  %v2478_v22 = vpop.f32.mrb[12].mxu0  ;;  %s344_s22 = scalar_lea.vmem [#allocation12], %s2187_s12  ;;  %s4149_s19 = scalar_lea.hbm %s4195_s7, %s2195_s11 }
 0x1dc   : > { %v1850_v43 = vsub.f32 %v1786_v42, %v2603_v32  ;;  %v1788_v3 = vmul.f32 %v2478_v22, %v2478_v22  ;;  %v1043_v6 = vpop.f32.mrb[13].mxu0  ;;  %v2606_v15 = vpop.f32.mrb[12].mxu1  ;;  %s2023_s23 = sshll.u32 %s344_s22, 4  ;;  %s3291_s15 = smov [#allocation12]   ;;  %s2024_s23 = int_to_ptr.vmem [resolvable:$true] %s2023_s23 }
 0x1dd   : > { %v1910_v17 = vadd.f32 %v1909_v31, %v1847_v30  ;;  %v1849_v4 = vsub.f32 %v1785_v48, %v1498_v45  ;;  %v1787_v38 = vmul.f32 %v1043_v6, %v1043_v6  ;;  %v1508_v47 = vpop.f32.mrb[13].mxu1  ;;  %v2481_v39 = vpop.f32.mrb[14].mxu0  ;;  %s3205_s20 = scalar_lea.vmem %s2024_s23, 128  ;;  %s3209_s24 = sshll.u32 %s3291_s15, 4  ;;  %s3210_s24 = int_to_ptr.vmem [resolvable:$false] %s3209_s24 }
 0x1de   : > { %v1852_v10 = vsub.f32 %v1788_v3, %v2606_v15  ;;  %v1790_v51 = vmul.f32 %v2481_v39, %v2481_v39  ;;  %v1053_v49 = vpop.f32.mrb[15].mxu0  ;;  %v2609_v5 = vpop.f32.mrb[14].mxu1  ;;  %p3206_p7 = scmp.ne.s32.totalorder %s2024_s23, %s3205_s20  ;;  %s3211_s2 = scalar_lea.vmem %s3210_s24, 256 }
 0x1df   : > { %v1911_v9 = vadd.f32 %v1910_v17, %v1848_v46  ;;  %v1851_v58 = vsub.f32 %v1787_v38, %v1508_v47  ;;  %v1789_v8 = vmul.f32 %v1053_v49, %v1053_v49  ;;  %v1518_v36 = vpop.f32.mrb[15].mxu1  ;;  %v2484_v11 = vpop.f32.mrb[16].mxu0  ;;  %p3212_p0 = scmp.lt.s32.totalorder %s2024_s23, %s3210_s24  ;;  %p3213_p5 = scmp.lt.s32.totalorder %s3211_s2, %s3205_s20 }
 0x1e0   : > { %v1854_v7 = vsub.f32 %v1790_v51, %v2609_v5  ;;  %v1792_v14 = vmul.f32 %v2484_v11, %v2484_v11  ;;  %v1063_v20 = vpop.f32.mrb[17].mxu0  ;;  %v2612_v23 = vpop.f32.mrb[16].mxu1  ;;  %p3207_p9 = pnand %p3206_p7, %p3455_p6 }
 0x1e1   : > { %v1912_v44 = vadd.f32 %v1911_v9, %v1849_v4  ;;  %v1853_v40 = vsub.f32 %v1789_v8, %v1518_v36  ;;  %v1791_v21 = vmul.f32 %v1063_v20, %v1063_v20  ;;  %v1528_v60 = vpop.f32.mrb[17].mxu1  ;;  %v2487_v59 = vpop.f32.mrb[18].mxu0  ;;  %p3214_p10 = por %p3213_p5, %p3212_p0 }
 0x1e2   : > { %v1856_v27 = vsub.f32 %v1792_v14, %v2612_v23  ;;  %v1794_v50 = vmul.f32 %v2487_v59, %v2487_v59  ;;  %v1073_v24 = vpop.f32.mrb[19].mxu0  ;;  %v2615_v26 = vpop.f32.mrb[18].mxu1  ;;  %p3208_p12 = pneg %p3207_p9 }
 0x1e3   : > { %v1913_v2 = vadd.f32 %v1912_v44, %v1850_v43  ;;  %v1855_v55 = vsub.f32 %v1791_v21, %v1528_v60  ;;  %v1793_v61 = vmul.f32 %v1073_v24, %v1073_v24  ;;  %v1538_v33 = vpop.f32.mrb[19].mxu1  ;;  %v2490_v34 = vpop.f32.mrb[20].mxu0 }
 0x1e4   : > { %v1858_v25 = vsub.f32 %v1794_v50, %v2615_v26  ;;  %v1796_v1 = vmul.f32 %v2490_v34, %v2490_v34  ;;  %v1083_v0 = vpop.f32.mrb[21].mxu0  ;;  %v2618_v13 = vpop.f32.mrb[20].mxu1  ;;  %p3215_p1 = pnand %p3214_p10, %p3208_p12 }
 0x1e5   : > { %v1914_v63 = vadd.f32 %v1913_v2, %v1851_v58  ;;  %v1857_v57 = vsub.f32 %v1793_v61, %v1538_v33  ;;  %v1795_v56 = vmul.f32 %v1083_v0, %v1083_v0  ;;  %v1548_v16 = vpop.f32.mrb[21].mxu1  ;;  %v2493_v46 = vpop.f32.mrb[22].mxu0 }
 0x1e6   : > { %v1860_v19 = vsub.f32 %v1796_v1, %v2618_v13  ;;  %v1798_v35 = vmul.f32 %v2493_v46, %v2493_v46  ;;  %v1093_v30 = vpop.f32.mrb[23].mxu0  ;;  %v2621_v42 = vpop.f32.mrb[22].mxu1 }
 0x1e7   : > { %v1915_v53 = vadd.f32 %v1914_v63, %v1852_v10  ;;  %v1859_v29 = vsub.f32 %v1795_v56, %v1548_v16  ;;  %v1797_v41 = vmul.f32 %v1093_v30, %v1093_v30  ;;  %v1558_v17 = vpop.f32.mrb[23].mxu1  ;;  %v2496_v43 = vpop.f32.mrb[24].mxu0 }
 0x1e8   : > { %v1862_v12 = vsub.f32 %v1798_v35, %v2621_v42  ;;  %v1800_v45 = vmul.f32 %v2496_v43, %v2496_v43  ;;  %v1103_v4 = vpop.f32.mrb[25].mxu0  ;;  %v2624_v3 = vpop.f32.mrb[24].mxu1 }
 0x1e9   : > { %v1916_v62 = vadd.f32 %v1915_v53, %v1853_v40  ;;  %v1861_v48 = vsub.f32 %v1797_v41, %v1558_v17  ;;  %v1799_v22 = vmul.f32 %v1103_v4, %v1103_v4  ;;  %v1568_v44 = vpop.f32.mrb[25].mxu1  ;;  %v2499_v10 = vpop.f32.mrb[26].mxu0 }
 0x1ea   : > { %v1864_v6 = vsub.f32 %v1800_v45, %v2624_v3  ;;  %v1802_v47 = vmul.f32 %v2499_v10, %v2499_v10  ;;  %v1113_v58 = vpop.f32.mrb[27].mxu0  ;;  %v2627_v51 = vpop.f32.mrb[26].mxu1 }
 0x1eb   : > { %v1917_v28 = vadd.f32 %v1916_v62, %v1854_v7  ;;  %v1863_v38 = vsub.f32 %v1799_v22, %v1568_v44  ;;  %v1801_v39 = vmul.f32 %v1113_v58, %v1113_v58  ;;  %v1578_v63 = vpop.f32.mrb[27].mxu1  ;;  %v2502_v7 = vpop.f32.mrb[28].mxu0 }
 0x1ec   : > { %v1866_v49 = vsub.f32 %v1802_v47, %v2627_v51  ;;  %v1804_v36 = vmul.f32 %v2502_v7, %v2502_v7  ;;  %v1123_v40 = vpop.f32.mrb[29].mxu0  ;;  %v2630_v14 = vpop.f32.mrb[28].mxu1 }
 0x1ed   : > { %v1918_v54 = vadd.f32 %v1917_v28, %v1855_v55  ;;  %v1865_v8 = vsub.f32 %v1801_v39, %v1578_v63  ;;  %v1803_v11 = vmul.f32 %v1123_v40, %v1123_v40  ;;  %v1588_v62 = vpop.f32.mrb[29].mxu1 }
 0x1ee   : > { %v1868_v20 = vsub.f32 %v1804_v36, %v2630_v14  ;;  %v2633_v50 = vpop.f32.mrb[30].mxu1 }
 0x1ef   : > { %v1919_v52 = vadd.f32 %v1918_v54, %v1856_v27  ;;  %v1867_v21 = vsub.f32 %v1803_v11, %v1588_v62  ;;  %v2505_v27 = vpop.f32.mrb[30].mxu0  ;;  %v1598_v54 = vpop.f32.mrb[31].mxu1 }
 0x1f0   : > { %v1806_v60 = vmul.f32 %v2505_v27, %v2505_v27  ;;  %v1133_v55 = vpop.f32.mrb[31].mxu0  ;;  %v2636_v1 = vpop.f32.mrb[32].mxu1 }
 0x1f1   : > { %v1920_v37 = vadd.f32 %v1919_v52, %v1857_v57  ;;  %v1805_v59 = vmul.f32 %v1133_v55, %v1133_v55 }
 0x1f2   : > { %v1870_v24 = vsub.f32 %v1806_v60, %v2633_v50 }
 0x1f3   : > { %v1921_v18 = vadd.f32 %v1920_v37, %v1858_v25  ;;  %v1869_v61 = vsub.f32 %v1805_v59, %v1598_v54  ;;  %v2508_v25 = vpop.f32.mrb[32].mxu0  ;;  %v1608_v37 = vpop.f32.mrb[33].mxu1 }
 0x1f4   : > { %v1808_v33 = vmul.f32 %v2508_v25, %v2508_v25  ;;  %v1143_v57 = vpop.f32.mrb[33].mxu0  ;;  %v2639_v35 = vpop.f32.mrb[34].mxu1 }
 0x1f5   : > { %v1922_v31 = vadd.f32 %v1921_v18, %v1859_v29  ;;  %v1807_v34 = vmul.f32 %v1143_v57, %v1143_v57 }
 0x1f6   : > { %v1872_v0 = vsub.f32 %v1808_v33, %v2636_v1 }
 0x1f7   : > { %v1923_v32 = vadd.f32 %v1922_v31, %v1860_v19  ;;  %v1871_v56 = vsub.f32 %v1807_v34, %v1608_v37  ;;  %v2511_v19 = vpop.f32.mrb[34].mxu0  ;;  %v1618_v31 = vpop.f32.mrb[35].mxu1 }
 0x1f8   : > { %v1810_v16 = vmul.f32 %v2511_v19, %v2511_v19  ;;  %v1153_v29 = vpop.f32.mrb[35].mxu0  ;;  %v2642_v45 = vpop.f32.mrb[36].mxu1 }
 0x1f9   : > { %v1924_v9 = vadd.f32 %v1923_v32, %v1861_v48  ;;  %v1809_v46 = vmul.f32 %v1153_v29, %v1153_v29 }
 0x1fa   : > { %v1874_v30 = vsub.f32 %v1810_v16, %v2639_v35 }
 0x1fb   : > { %v1925_v15 = vadd.f32 %v1924_v9, %v1862_v12  ;;  %v1873_v41 = vsub.f32 %v1809_v46, %v1618_v31  ;;  %v2514_v12 = vpop.f32.mrb[36].mxu0  ;;  %v1628_v9 = vpop.f32.mrb[37].mxu1 }
 0x1fc   : > { %v1812_v17 = vmul.f32 %v2514_v12, %v2514_v12  ;;  %v1163_v48 = vpop.f32.mrb[37].mxu0  ;;  %v2645_v47 = vpop.f32.mrb[38].mxu1 }
 0x1fd   : > { %v1926_v2 = vadd.f32 %v1925_v15, %v1863_v38  ;;  %v1811_v43 = vmul.f32 %v1163_v48, %v1163_v48 }
 0x1fe   : > { %v1876_v4 = vsub.f32 %v1812_v17, %v2642_v45 }
 0x1ff   : > { %v1927_v5 = vadd.f32 %v1926_v2, %v1864_v6  ;;  %v1875_v22 = vsub.f32 %v1811_v43, %v1628_v9  ;;  %v2517_v6 = vpop.f32.mrb[38].mxu0  ;;  %v1638_v2 = vpop.f32.mrb[39].mxu1 }
 0x200   : > { %v1814_v44 = vmul.f32 %v2517_v6, %v2517_v6  ;;  %v1173_v38 = vpop.f32.mrb[39].mxu0  ;;  %v2648_v36 = vpop.f32.mrb[40].mxu1 }
 0x201   : > { %v1928_v53 = vadd.f32 %v1927_v5, %v1865_v8  ;;  %v1813_v10 = vmul.f32 %v1173_v38, %v1173_v38 }
 0x202   : > { %v1878_v58 = vsub.f32 %v1814_v44, %v2645_v47 }
 0x203   : > { %v1929_v23 = vadd.f32 %v1928_v53, %v1866_v49  ;;  %v1877_v39 = vsub.f32 %v1813_v10, %v1638_v2  ;;  %v2520_v49 = vpop.f32.mrb[40].mxu0  ;;  %v1648_v53 = vpop.f32.mrb[41].mxu1 }
 0x204   : > { %v1816_v63 = vmul.f32 %v2520_v49, %v2520_v49  ;;  %v1183_v8 = vpop.f32.mrb[41].mxu0  ;;  %v2651_v60 = vpop.f32.mrb[42].mxu1 }
 0x205   : > { %v1930_v28 = vadd.f32 %v1929_v23, %v1867_v21  ;;  %v1815_v7 = vmul.f32 %v1183_v8, %v1183_v8 }
 0x206   : > { %v1880_v40 = vsub.f32 %v1816_v63, %v2648_v36 }
 0x207   : > { %v1931_v26 = vadd.f32 %v1930_v28, %v1868_v20  ;;  %v1879_v11 = vsub.f32 %v1815_v7, %v1648_v53  ;;  %v2523_v20 = vpop.f32.mrb[42].mxu0  ;;  %v1658_v28 = vpop.f32.mrb[43].mxu1 }
 0x208   : > { %v1818_v62 = vmul.f32 %v2523_v20, %v2523_v20  ;;  %v1193_v21 = vpop.f32.mrb[43].mxu0  ;;  %v2654_v33 = vpop.f32.mrb[44].mxu1 }
 0x209   : > { %v1932_v52 = vadd.f32 %v1931_v26, %v1869_v61  ;;  %v1817_v27 = vmul.f32 %v1193_v21, %v1193_v21 }
 0x20a   : > { %v1882_v55 = vsub.f32 %v1818_v62, %v2651_v60 }
 0x20b   : > { %v1933_v13 = vadd.f32 %v1932_v52, %v1870_v24  ;;  %v1881_v59 = vsub.f32 %v1817_v27, %v1658_v28  ;;  %v2526_v24 = vpop.f32.mrb[44].mxu0  ;;  %v1668_v52 = vpop.f32.mrb[45].mxu1 }
 0x20c   : > { %v1820_v54 = vmul.f32 %v2526_v24, %v2526_v24  ;;  %v1203_v61 = vpop.f32.mrb[45].mxu0  ;;  %v2657_v16 = vpop.f32.mrb[46].mxu1 }
 0x20d   : > { %v1934_v18 = vadd.f32 %v1933_v13, %v1871_v56  ;;  %v1819_v25 = vmul.f32 %v1203_v61, %v1203_v61 }
 0x20e   : > { %v1884_v57 = vsub.f32 %v1820_v54, %v2654_v33 }
 0x20f   : > { %v1935_v42 = vadd.f32 %v1934_v18, %v1872_v0  ;;  %v1883_v34 = vsub.f32 %v1819_v25, %v1668_v52  ;;  %v2529_v0 = vpop.f32.mrb[46].mxu0  ;;  %v1678_v18 = vpop.f32.mrb[47].mxu1 }
 0x210   : > { %v1822_v37 = vmul.f32 %v2529_v0, %v2529_v0  ;;  %v1213_v56 = vpop.f32.mrb[47].mxu0  ;;  %v2660_v17 = vpop.f32.mrb[48].mxu1 }
 0x211   : > { %v1936_v32 = vadd.f32 %v1935_v42, %v1873_v41  ;;  %v1821_v19 = vmul.f32 %v1213_v56, %v1213_v56 }
 0x212   : > { %v1886_v29 = vsub.f32 %v1822_v37, %v2657_v16 }
 0x213   : > { %v1937_v3 = vadd.f32 %v1936_v32, %v1874_v30  ;;  %v1885_v46 = vsub.f32 %v1821_v19, %v1678_v18  ;;  %v2532_v30 = vpop.f32.mrb[48].mxu0  ;;  %v1688_v32 = vpop.f32.mrb[49].mxu1 }
 0x214   : > { %v1824_v31 = vmul.f32 %v2532_v30, %v2532_v30  ;;  %v1223_v41 = vpop.f32.mrb[49].mxu0  ;;  %v2663_v44 = vpop.f32.mrb[50].mxu1 }
 0x215   : > { %v1938_v15 = vadd.f32 %v1937_v3, %v1875_v22  ;;  %v1823_v12 = vmul.f32 %v1223_v41, %v1223_v41 }
 0x216   : > { %v1888_v48 = vsub.f32 %v1824_v31, %v2660_v17 }
 0x217   : > { %v1939_v51 = vadd.f32 %v1938_v15, %v1876_v4  ;;  %v1887_v43 = vsub.f32 %v1823_v12, %v1688_v32  ;;  %v2535_v4 = vpop.f32.mrb[50].mxu0  ;;  %v1698_v15 = vpop.f32.mrb[51].mxu1 }
 0x218   : > { %v1826_v9 = vmul.f32 %v2535_v4, %v2535_v4  ;;  %v1233_v22 = vpop.f32.mrb[51].mxu0  ;;  %v2666_v63 = vpop.f32.mrb[52].mxu1 }
 0x219   : > { %v1940_v5 = vadd.f32 %v1939_v51, %v1877_v39  ;;  %v1825_v6 = vmul.f32 %v1233_v22, %v1233_v22 }
 0x21a   : > { %v1890_v38 = vsub.f32 %v1826_v9, %v2663_v44 }
 0x21b   : > { %v1941_v14 = vadd.f32 %v1940_v5, %v1878_v58  ;;  %v1889_v10 = vsub.f32 %v1825_v6, %v1698_v15  ;;  %v2538_v58 = vpop.f32.mrb[52].mxu0  ;;  %v1708_v5 = vpop.f32.mrb[53].mxu1 }
 0x21c   : > { %v1828_v2 = vmul.f32 %v2538_v58, %v2538_v58  ;;  %v1243_v39 = vpop.f32.mrb[53].mxu0  ;;  %v2669_v62 = vpop.f32.mrb[54].mxu1 }
 0x21d   : > { %v1942_v23 = vadd.f32 %v1941_v14, %v1879_v11  ;;  %v1827_v49 = vmul.f32 %v1243_v39, %v1243_v39 }
 0x21e   : > { %v1892_v8 = vsub.f32 %v1828_v2, %v2666_v63 }
 0x21f   : > { %v1943_v50 = vadd.f32 %v1942_v23, %v1880_v40  ;;  %v1891_v7 = vsub.f32 %v1827_v49, %v1708_v5  ;;  %v2541_v40 = vpop.f32.mrb[54].mxu0  ;;  %v1718_v23 = vpop.f32.mrb[55].mxu1 }
 0x220   : > { %v1830_v53 = vmul.f32 %v2541_v40, %v2541_v40  ;;  %v1253_v11 = vpop.f32.mrb[55].mxu0  ;;  %v2672_v54 = vpop.f32.mrb[56].mxu1 }
 0x221   : > { %v1944_v26 = vadd.f32 %v1943_v50, %v1881_v59  ;;  %v1829_v20 = vmul.f32 %v1253_v11, %v1253_v11 }
 0x222   : > { %v1894_v21 = vsub.f32 %v1830_v53, %v2669_v62 }
 0x223   : > { %v1945_v1 = vadd.f32 %v1944_v26, %v1882_v55  ;;  %v1893_v27 = vsub.f32 %v1829_v20, %v1718_v23  ;;  %v2544_v55 = vpop.f32.mrb[56].mxu0  ;;  %v1728_v26 = vpop.f32.mrb[57].mxu1 }
 0x224   : > { %v1832_v28 = vmul.f32 %v2544_v55, %v2544_v55  ;;  %v1263_v59 = vpop.f32.mrb[57].mxu0  ;;  %v2675_v37 = vpop.f32.mrb[58].mxu1 }
 0x225   : > { %v1946_v13 = vadd.f32 %v1945_v1, %v1883_v34  ;;  %v1831_v24 = vmul.f32 %v1263_v59, %v1263_v59 }
 0x226   : > { %v1896_v61 = vsub.f32 %v1832_v28, %v2672_v54 }
 0x227   : > { %v1947_v35 = vadd.f32 %v1946_v13, %v1884_v57  ;;  %v1895_v25 = vsub.f32 %v1831_v24, %v1728_v26  ;;  %v2547_v57 = vpop.f32.mrb[58].mxu0  ;;  %v1738_v13 = vpop.f32.mrb[59].mxu1 }
 0x228   : > { %v1834_v52 = vmul.f32 %v2547_v57, %v2547_v57  ;;  %v1273_v34 = vpop.f32.mrb[59].mxu0  ;;  %v2678_v31 = vpop.f32.mrb[60].mxu1 }
 0x229   : > { %v1948_v42 = vadd.f32 %v1947_v35, %v1885_v46  ;;  %v1833_v0 = vmul.f32 %v1273_v34, %v1273_v34 }
 0x22a   : > { %v1898_v56 = vsub.f32 %v1834_v52, %v2675_v37 }
 0x22b   : > { %v1949_v45 = vadd.f32 %v1948_v42, %v1886_v29  ;;  %v1897_v19 = vsub.f32 %v1833_v0, %v1738_v13  ;;  %v2550_v29 = vpop.f32.mrb[60].mxu0  ;;  %v1748_v42 = vpop.f32.mrb[61].mxu1 }
 0x22c   : > { %v1836_v18 = vmul.f32 %v2550_v29, %v2550_v29  ;;  %v1283_v46 = vpop.f32.mrb[61].mxu0  ;;  %v2681_v9 = vpop.f32.mrb[62].mxu1 }
 0x22d   : > { %v1950_v3 = vadd.f32 %v1949_v45, %v1887_v43  ;;  %v1835_v30 = vmul.f32 %v1283_v46, %v1283_v46 }
 0x22e   : > { %v1900_v41 = vsub.f32 %v1836_v18, %v2678_v31 }
 0x22f   : > { %v1951_v47 = vadd.f32 %v1950_v3, %v1888_v48  ;;  %v1899_v12 = vsub.f32 %v1835_v30, %v1748_v42  ;;  %v2553_v48 = vpop.f32.mrb[62].mxu0  ;;  %v1758_v3 = vpop.f32.mrb[63].mxu1 }
 0x230   : > { %v1838_v32 = vmul.f32 %v2553_v48, %v2553_v48  ;;  %v1293_v43 = vpop.f32.mrb[63].mxu0  ;;  %v2684_v2 = vpop.f32.mrb[64].mxu1 }
 0x231   : > { %v1952_v51 = vadd.f32 %v1951_v47, %v1889_v10  ;;  %v1837_v4 = vmul.f32 %v1293_v43, %v1293_v43 }
 0x232   : > { %v1902_v22 = vsub.f32 %v1838_v32, %v2681_v9 }
 0x233   : > { %v1953_v36 = vadd.f32 %v1952_v51, %v1890_v38  ;;  %v1901_v6 = vsub.f32 %v1837_v4, %v1758_v3  ;;  %v2556_v38 = vpop.f32.mrb[64].mxu0  ;;  %v1768_v51 = vpop.f32.mrb[65].mxu1 }
 0x234   : > { %v1840_v15 = vmul.f32 %v2556_v38, %v2556_v38  ;;  %v1303_v10 = vpop.f32.mrb[65].mxu0 }
 0x235   : > { %v1954_v14 = vadd.f32 %v1953_v36, %v1891_v7  ;;  %v1839_v58 = vmul.f32 %v1303_v10, %v1303_v10 }
 0x236   : > { %v1904_v39 = vsub.f32 %v1840_v15, %v2684_v2 }
 0x237   : > { %v1955_v60 = vadd.f32 %v1954_v14, %v1892_v8  ;;  %v1903_v49 = vsub.f32 %v1839_v58, %v1768_v51 }
 0x239   : > { %v1956_v50 = vadd.f32 %v1955_v60, %v1893_v27 }
 0x23b   : > { %v1957_v33 = vadd.f32 %v1956_v50, %v1894_v21 }
 0x23d   : > { %v1958_v1 = vadd.f32 %v1957_v33, %v1895_v25 }
 0x23f   : > { %v1959_v16 = vadd.f32 %v1958_v1, %v1896_v61 }
 0x241   : > { %v1960_v35 = vadd.f32 %v1959_v16, %v1897_v19 }
 0x243   : > { %v1961_v17 = vadd.f32 %v1960_v35, %v1898_v56 }
 0x245   : > { %v1962_v45 = vadd.f32 %v1961_v17, %v1899_v12 }
 0x247   : > { %v1963_v44 = vadd.f32 %v1962_v45, %v1900_v41 }
 0x249   : > { %v1964_v47 = vadd.f32 %v1963_v44, %v1901_v6 }
 0x24b   : > { %v1965_v63 = vadd.f32 %v1964_v47, %v1902_v22 }
 0x24d   : > { %v1966_v8 = vadd.f32 %v1965_v63, %v1903_v49 }
 0x24f   : > { %v1967_v5 = vadd.f32 %v1966_v8, %v1904_v39 }
 0x251   : > { %1968 = vst [vmem:[%s344_s22] sm:$0xff] %v1967_v5 }
 0x252   : > { %3218 = shalt.err (!%p3215_p1)
}
 0x253   : > { %s3219_s10 = scalar_lea.hbm %s4149_s19, 128  ;;  %s3223_s8 = scalar_lea.hbm %s4195_s7, 384 }
 0x254   : > { %p3220_p2 = scmp.ne.s32.totalorder %s4149_s19, %s3219_s10  ;;  %p3224_p11 = scmp.lt.u32.totalorder %s4149_s19, %s4195_s7 }
 0x255   : > { %p3225_p13 = scmp.lt.u32.totalorder %s3223_s8, %s3219_s10  ;;  %p3227_p7 = scmp.lt.u32.totalorder %s3219_s10, %s4149_s19 }
 0x256   : > { %p3221_p4 = pnand %p3220_p2, %p3455_p6 }
 0x257   : > { %p3226_p3 = por %p3225_p13, %p3224_p11 }
 0x258   : > { %p3222_p8 = pneg %p3221_p4 }
 0x259   : > { %p3228_p9 = por %p3227_p7, %p3226_p3 }
 0x25b   : > { %p3229_p12 = pnand %p3228_p9, %p3222_p8 }
 0x25d   : > { %3232 = shalt.err (!%p3229_p12)
}
 0x25e   : > { %2825 = dma.vmem_to_hbm [thread:$0]  (%p3455_p6), %s2024_s23, 128, %s4149_s19, %s4086_s14  }
 0x25f PF: > { %p2855_p0 = scmp.ge.s32.totalorder %s3279_s29, 2  ;;  %s2035_s22 = sand.u32 1, %s3267_s26  }
 0x260   : > { %p4211_p5 = scmp.ne.s32.totalorder %s4201_s9, 0  ;;  %s2036_s16 = scalar_lea.sflag [#allocation5], %s2035_s22 }
 0x262   : > { %p2841_p10 = pnand %p2855_p0, %p4211_p5 }
 0x264   : > { %3258 = dma.done.wait (!%p2841_p10), %s2036_s16, 8192  }
 0x265   : > { %3260 = vsyncadd (!%p2841_p10), %s2036_s16, 4294959104  ;;  %s4212_s30 = sadd.s32 4294967294, %s3279_s29  }
 0x266   : > { %s2044_s20 = sand.u32 1, %s4212_s30  }
 0x267   : > { %s2045_s15 = scalar_lea.sflag [#allocation11], %s2044_s20 }
 0x268   : > { %3262 = dma.done.wait (!%p2841_p10), %s2045_s15, 192  }
 0x269   : > { %3264 = vsyncadd (!%p2841_p10), %s2045_s15, 4294967104  ;;  %p26_p6 = scmp.ge.s32.totalorder %s3445_s13, 5   ;;  %s4213_s26 = smov %s3271_s27 }
 0x26a   : > { %s4214_s27 = smov %s3275_s28  ;;  %s4215_s28 = smov %s3461_s18 }
 0x26b   : > { %s4216_s29 = smov %s3445_s13  ;;  %28 = sbr.rel (!%p26_p6) target bundleno = 10 (0xa), region = 125 }
 0x272   :  { %2059 = vsyncpa [#allocation4], 1 }
 0x273   :  { %2061 = vsyncpa [#allocation4 + $0x1], 1 }
 0x274   :  { %2062 = vsyncpa [#allocation7], 1 }
 0x275   :  { %2063 = vsyncpa [#allocation5], 1 }
 0x276   :  { %2065 = vsyncpa [#allocation5 + $0x1], 1 }
 0x277   :  { %2066 = vsyncpa [#allocation11], 1 }
 0x278   :  { %2068 = vsyncpa [#allocation11 + $0x1], 1 }

</bundles_post_ra>
